<compile_context>
chip_gen: v6e
topology: v6e:2x2x1
jax: 0.10.0
libtpu: 0.0.40
codegen_flags: <defaults>
</compile_context>

<pallas_src>
import functools

import jax
import jax.numpy as jnp
import numpy as np
from jax.experimental import pallas as pl
from jax.experimental.pallas import tpu as pltpu

NEG_SLOPE = 0.1  # leaky_relu negative slope used by ReLULayer


def default_mxu_dtype():
    """bf16 matmuls/activations on v6e/v7x (native bf16 VPU); f32 otherwise (v5e...)."""
    try:
        kind = jax.devices()[0].device_kind.lower()
        if any(tag in kind for tag in ("v6", "v7", "7x")):
            return jnp.bfloat16
    except Exception:
        pass
    return jnp.float32


def _make_mlp_kernel(num_layers, skip_idx, in_f, hidden, out_f, act_dtype):
    """Fused kernel applying the whole ReLUNetwork to one feature-major tile.

    Refs:
      cf_ref : (in_f, TILE_N) f32          input points (feature-major)
      wx_ref : (hidden, 2*in_f) f32        [W0 | W_skip_x], omega folded
      wh_ref : (L-1, rows, hidden) mxu dt  hidden->hidden weights (+ padded last)
      b_ref  : (rows, L) f32               biases, one column per layer
      out_ref: (out_f, TILE_N) f32
    """

    def leaky(z):
        return jnp.maximum(z, NEG_SLOPE * z)

    def kernel(cf_ref, wx_ref, wh_ref, b_ref, out_ref):
        x = cf_ref[...]                                       # (in_f, TN) f32
        # Layer 0: K=in_f matmul kept in f32 so input coords are not quantized.
        z = jnp.dot(wx_ref[:, :in_f], x, preferred_element_type=jnp.float32)
        z = z + b_ref[:hidden, 0:1]
        h = leaky(z.astype(act_dtype))                        # activation in narrow dtype
        for li in range(1, num_layers - 1):
            w = wh_ref[li - 1][:hidden, :]                    # (hidden, hidden)
            z = jnp.dot(w, h, preferred_element_type=jnp.float32)
            if li == skip_idx:                                # skip: + W_x @ coords (f32)
                z = z + jnp.dot(wx_ref[:, in_f:], x,
                                preferred_element_type=jnp.float32)
            z = z + b_ref[:hidden, li:li + 1]                 # bias add in f32
            h = leaky(z.astype(act_dtype))
        w_last = wh_ref[num_layers - 2][:out_f, :]            # (out_f, hidden)
        out_ref[...] = (jnp.dot(w_last, h, preferred_element_type=jnp.float32)
                        + b_ref[:out_f, num_layers - 1:num_layers])

    return kernel


def prepare_params(params, *, omega, in_features, mxu_dtype=jnp.bfloat16):
    """One-time repack of (W:(in,out), b:(1,out)) params into three slabs.

    - transpose weights to (out, in), fold omega into every non-final layer
    - x-facing weights (layer 0 + skip x-branch) stay f32 -> wx_slab (hidden, 2*in_f)
    - hidden->hidden weights (incl. padded last layer) -> wh_slab (L-1, rows, hidden)
    - biases -> b_slab (rows, L) f32
    Returns ((wx_slab, wh_slab, b_slab), num_layers, skip_idx).
    """
    num_layers = len(params)
    skip_idx = 1 + (num_layers - 2) // 2
    hidden = params[0][0].shape[1]
    out_f = params[-1][0].shape[1]
    rows = max(hidden, out_f)

    wx_blocks, wh_blocks, b_cols = [], [], []
    for i, (w, b) in enumerate(params):
        wt = jnp.asarray(w, jnp.float32).T                  # (out, in)
        if i < num_layers - 1:
            wt = wt * omega                                 # fold omega into weights
        bt = jnp.asarray(b, jnp.float32).reshape(-1)
        b_cols.append(jnp.pad(bt, (0, rows - bt.shape[0])))
        if i == 0:
            wx_blocks.append(wt)                            # (hidden, in_f) f32
        elif i == skip_idx:
            wh_blocks.append(jnp.pad(wt[:, :hidden],
                                     ((0, rows - wt.shape[0]), (0, 0))))
            wx_blocks.append(wt[:, hidden:])                # (hidden, in_f) f32
        else:
            wh_blocks.append(jnp.pad(wt, ((0, rows - wt.shape[0]), (0, 0))))

    wx_slab = jnp.concatenate(wx_blocks, axis=1).astype(jnp.float32)
    wh_slab = jnp.stack(wh_blocks, axis=0).astype(mxu_dtype)
    b_slab = jnp.stack(b_cols, axis=1).astype(jnp.float32)
    return (wx_slab, wh_slab, b_slab), num_layers, skip_idx


@functools.partial(jax.jit,
                   static_argnames=("num_layers", "skip_idx", "out_features", "tile_n"))
def relu_network_forward(coords, coords_fused, wx_slab, wh_slab, b_slab, *,
                         num_layers, skip_idx, out_features, tile_n=4096):
    """Apply the fused MLP kernel. Returns (output (N, out_features), coords)."""
    N, in_f = coords_fused.shape
    hidden = wh_slab.shape[2]
    out_f = out_features
    assert tile_n % 128 == 0, "tile_n must be a multiple of 128 lanes"

    # Even number of grid steps (>=2) so v7x's two TensorCores stay balanced
    # under dimension_semantics=("parallel",); shrink the tile for small N so
    # padding stays modest. Per-tile VMEM is tiny even at tile 8192.
    n_steps = max(2, -(-N // tile_n))
    if n_steps % 2:
        n_steps += 1
    tile = min(tile_n, ((-(-N // n_steps) + 127) // 128) * 128)
    n_pad = n_steps * tile

    # Feature-major (in_f, n_pad) f32: points on the 128-lane axis. Kept f32 so
    # the K=in_f matmuls see unquantized coordinates. Pad/transpose fuse with
    # the pallas_call under this jit (no extra HBM round trip).
    cf = jnp.pad(coords_fused.astype(jnp.float32), ((0, n_pad - N), (0, 0))).T

    kernel = _make_mlp_kernel(num_layers, skip_idx, in_f, hidden, out_f,
                              act_dtype=wh_slab.dtype)

    flops = 2 * n_pad * (2 * hidden * in_f
                         + (num_layers - 2) * hidden * hidden
                         + out_f * hidden)
    bytes_accessed = (cf.size * 4 + n_pad * out_f * 4
                      + wx_slab.size * 4
                      + wh_slab.size * wh_slab.dtype.itemsize
                      + b_slab.size * 4)

    out = pl.pallas_call(
        kernel,
        out_shape=jax.ShapeDtypeStruct((out_f, n_pad), jnp.float32),
        grid=(n_steps,),
        in_specs=[
            pl.BlockSpec((in_f, tile), lambda i: (0, i)),
            # Constant parameter slabs: one operand each, block == full array,
            # block index never changes across the grid.
            pl.BlockSpec(wx_slab.shape, lambda i: (0, 0)),
            pl.BlockSpec(wh_slab.shape, lambda i: (0, 0, 0)),
            pl.BlockSpec(b_slab.shape, lambda i: (0, 0)),
        ],
        out_specs=pl.BlockSpec((out_f, tile), lambda i: (0, i)),
        compiler_params=pltpu.CompilerParams(dimension_semantics=("parallel",)),
        cost_estimate=pl.CostEstimate(flops=flops, transcendentals=0,
                                      bytes_accessed=bytes_accessed),
    )(cf, wx_slab, wh_slab, b_slab)

    if out_f == 1:
        result = out.reshape(n_pad, 1)[:N]      # pure reshape, no transpose/relayout
    else:
        result = out.T[:N]
    return result, coords


def init_relu_network_params(key, in_features, hidden_features, hidden_layers,
                             out_features, first_omega_0=30.0, hidden_omega_0=30.0):
    """Deterministic parameter init matching ReLUNetwork.__init__ shapes.

    ReLULayer weights: uniform(-1/(omega_0*in), 1/(omega_0*in)) (omega_0 > 1).
    Biases / final linear: PyTorch default uniform(-1/sqrt(in), 1/sqrt(in)).
    Stored as W: (in, out), b: (1, out)  (checkpoint-style layout).
    """
    def relu_layer(k, fin, fout, omega0):
        kw, kb = jax.random.split(k)
        lim_w = 1.0 / (omega0 * fin)
        lim_b = 1.0 / np.sqrt(fin)
        w = jax.random.uniform(kw, (fin, fout), jnp.float32, -lim_w, lim_w)
        b = jax.random.uniform(kb, (1, fout), jnp.float32, -lim_b, lim_b)
        return w, b

    def plain_linear(k, fin, fout):
        kw, kb = jax.random.split(k)
        lim = 1.0 / np.sqrt(fin)
        w = jax.random.uniform(kw, (fin, fout), jnp.float32, -lim, lim)
        b = jax.random.uniform(kb, (1, fout), jnp.float32, -lim, lim)
        return w, b

    params = []
    keys = jax.random.split(key, hidden_layers + 2)
    params.append(relu_layer(keys[0], in_features, hidden_features, first_omega_0))
    for i in range(hidden_layers):
        if i == hidden_layers // 2:
            fin = hidden_features + in_features
        else:
            fin = hidden_features
        params.append(relu_layer(keys[1 + i], fin, hidden_features, hidden_omega_0))
    params.append(plain_linear(keys[-1], hidden_features, out_features))
    return params


def _reference_forward(coords, coords_fused, params, omega):
    """Pure-JAX f32 reference mirroring the PyTorch forward exactly."""
    num_layers = len(params)
    skip_idx = 1 + (num_layers - 2) // 2
    h = coords_fused
    for i in range(num_layers - 1):
        if i == skip_idx:
            h = jnp.concatenate([h, coords_fused], axis=-1)
        w, b = params[i]
        z = (h * omega) @ w + b
        h = jnp.where(z > 0, z, NEG_SLOPE * z)
    w, b = params[-1]
    return h @ w + b, coords


if __name__ == "__main__":
    # Small config consistent with an implicit-font coordinate MLP.
    in_features = 2
    hidden_features = 32
    hidden_layers = 3
    out_features = 1
    first_omega_0 = 30.0
    hidden_omega_0 = 30.0
    N = 2500        # not a multiple of the tile (exercises padding / adaptive tiling)
    TILE_N = 4096   # large tile amortizes per-step overhead; wrapper shrinks it for
                    # small N and always keeps an even (>=2) step count for v7x.

    key = jax.random.PRNGKey(0)
    k_params, k_coords, k_fused = jax.random.split(key, 3)

    params = init_relu_network_params(
        k_params, in_features, hidden_features, hidden_layers, out_features,
        first_omega_0=first_omega_0, hidden_omega_0=hidden_omega_0)

    coords = jax.random.uniform(k_coords, (N, in_features), jnp.float32, -1.0, 1.0)
    coords_fused = jax.random.uniform(k_fused, (N, in_features), jnp.float32, -1.0, 1.0)

    # One-time parameter prep: transpose, fold omega, split skip weight, pack
    # into 3 slabs. bf16 hidden path on v6e/v7x, pure f32 on v5e-class chips.
    mxu_dtype = default_mxu_dtype()
    (wx_slab, wh_slab, b_slab), num_layers, skip_idx = prepare_params(
        params, omega=first_omega_0, in_features=in_features, mxu_dtype=mxu_dtype)

    out, coords_out = relu_network_forward(
        coords, coords_fused, wx_slab, wh_slab, b_slab,
        num_layers=num_layers, skip_idx=skip_idx, out_features=out_features,
        tile_n=TILE_N)
    out = jax.block_until_ready(out)

    ref_out, _ = _reference_forward(coords, coords_fused, params, first_omega_0)
    assert out.shape == (N, out_features)
    assert coords_out.shape == coords.shape
    # bf16 hidden matmuls with f32 accumulation (inputs stay f32) -> 2e-2 budget.
    np.testing.assert_allclose(np.asarray(out), np.asarray(ref_out),
                               rtol=2e-2, atol=2e-2)

    print("KERNEL_OK")
</pallas_src>

<mosaic_0001>
module attributes {stable_mosaic.version = 11 : i64} {
  func.func @kernel(%arg0: i32, %arg1: memref<2x1280xf32, #tpu.memory_space<vmem>>, %arg2: memref<32x4xf32, #tpu.memory_space<vmem>>, %arg3: memref<4x32x32xf32, #tpu.memory_space<vmem>>, %arg4: memref<32x5xf32, #tpu.memory_space<vmem>>, %arg5: memref<1x1280xf32, #tpu.memory_space<vmem>>) attributes {dimension_semantics = [#tpu.dimension_semantics<parallel>], iteration_bounds = array<i64: 2>, scalar_prefetch = 0 : i64, scratch_operands = 0 : i64, tpu.core_type = #tpu.core_type<tc>, window_params = [{transform_indices = @transform_0, window_bounds = array<i64: 2, 1280>}, {pipeline_mode = #tpu.pipeline_mode<synchronous>, transform_indices = @transform_1, window_bounds = array<i64: 32, 4>}, {pipeline_mode = #tpu.pipeline_mode<synchronous>, transform_indices = @transform_2, window_bounds = array<i64: 4, 32, 32>}, {pipeline_mode = #tpu.pipeline_mode<synchronous>, transform_indices = @transform_3, window_bounds = array<i64: 32, 5>}, {transform_indices = @transform_4, window_bounds = array<i64: 1, 1280>}]} {
    %c0 = arith.constant 0 : index
    %c0_0 = arith.constant 0 : index
    %0 = vector.load %arg1[%c0, %c0_0] : memref<2x1280xf32, #tpu.memory_space<vmem>>, vector<2x1280xf32>
    %c0_1 = arith.constant 0 : index
    %c0_2 = arith.constant 0 : index
    %1 = vector.load %arg2[%c0_1, %c0_2] : memref<32x4xf32, #tpu.memory_space<vmem>>, vector<32x2xf32>
    %cst = arith.constant dense<0.000000e+00> : vector<32x1280xf32>
    %2 = tpu.matmul %1, %0, %cst {dimension_numbers = #tpu.dot_dimension_numbers<[1], [0], [0], [1], [0, 0, 1, 1], [], []>} : vector<32x2xf32>, vector<2x1280xf32>, vector<32x1280xf32> -> vector<32x1280xf32>
    %c0_3 = arith.constant 0 : index
    %c0_4 = arith.constant 0 : index
    %3 = vector.load %arg4[%c0_3, %c0_4] : memref<32x5xf32, #tpu.memory_space<vmem>>, vector<32x1xf32>
    %4 = vector.broadcast %3 : vector<32x1xf32> to vector<32x1280xf32>
    %5 = arith.addf %2, %4 : vector<32x1280xf32>
    %cst_5 = arith.constant 1.000000e-01 : f32
    %6 = vector.broadcast %cst_5 : f32 to vector<32x1280xf32>
    %7 = arith.mulf %6, %5 : vector<32x1280xf32>
    %8 = arith.maximumf %5, %7 : vector<32x1280xf32>
    %c0_6 = arith.constant 0 : index
    %c0_7 = arith.constant 0 : index
    %c0_8 = arith.constant 0 : index
    %9 = vector.load %arg3[%c0_6, %c0_7, %c0_8] : memref<4x32x32xf32, #tpu.memory_space<vmem>>, vector<1x32x32xf32>
    %10 = vector.shape_cast %9 : vector<1x32x32xf32> to vector<32x32xf32>
    %cst_9 = arith.constant dense<0.000000e+00> : vector<32x1280xf32>
    %11 = tpu.matmul %10, %8, %cst_9 {dimension_numbers = #tpu.dot_dimension_numbers<[1], [0], [0], [1], [0, 0, 1, 1], [], []>} : vector<32x32xf32>, vector<32x1280xf32>, vector<32x1280xf32> -> vector<32x1280xf32>
    %c0_10 = arith.constant 0 : index
    %c1 = arith.constant 1 : index
    %12 = vector.load %arg4[%c0_10, %c1] : memref<32x5xf32, #tpu.memory_space<vmem>>, vector<32x1xf32>
    %13 = vector.broadcast %12 : vector<32x1xf32> to vector<32x1280xf32>
    %14 = arith.addf %11, %13 : vector<32x1280xf32>
    %cst_11 = arith.constant 1.000000e-01 : f32
    %15 = vector.broadcast %cst_11 : f32 to vector<32x1280xf32>
    %16 = arith.mulf %15, %14 : vector<32x1280xf32>
    %17 = arith.maximumf %14, %16 : vector<32x1280xf32>
    %c1_12 = arith.constant 1 : index
    %c0_13 = arith.constant 0 : index
    %c0_14 = arith.constant 0 : index
    %18 = vector.load %arg3[%c1_12, %c0_13, %c0_14] : memref<4x32x32xf32, #tpu.memory_space<vmem>>, vector<1x32x32xf32>
    %19 = vector.shape_cast %18 : vector<1x32x32xf32> to vector<32x32xf32>
    %cst_15 = arith.constant dense<0.000000e+00> : vector<32x1280xf32>
    %20 = tpu.matmul %19, %17, %cst_15 {dimension_numbers = #tpu.dot_dimension_numbers<[1], [0], [0], [1], [0, 0, 1, 1], [], []>} : vector<32x32xf32>, vector<32x1280xf32>, vector<32x1280xf32> -> vector<32x1280xf32>
    %c0_16 = arith.constant 0 : index
    %c2 = arith.constant 2 : index
    %21 = vector.load %arg2[%c0_16, %c2] : memref<32x4xf32, #tpu.memory_space<vmem>>, vector<32x2xf32>
    %cst_17 = arith.constant dense<0.000000e+00> : vector<32x1280xf32>
    %22 = tpu.matmul %21, %0, %cst_17 {dimension_numbers = #tpu.dot_dimension_numbers<[1], [0], [0], [1], [0, 0, 1, 1], [], []>} : vector<32x2xf32>, vector<2x1280xf32>, vector<32x1280xf32> -> vector<32x1280xf32>
    %23 = arith.addf %20, %22 : vector<32x1280xf32>
    %c0_18 = arith.constant 0 : index
    %c2_19 = arith.constant 2 : index
    %24 = vector.load %arg4[%c0_18, %c2_19] : memref<32x5xf32, #tpu.memory_space<vmem>>, vector<32x1xf32>
    %25 = vector.broadcast %24 : vector<32x1xf32> to vector<32x1280xf32>
    %26 = arith.addf %23, %25 : vector<32x1280xf32>
    %cst_20 = arith.constant 1.000000e-01 : f32
    %27 = vector.broadcast %cst_20 : f32 to vector<32x1280xf32>
    %28 = arith.mulf %27, %26 : vector<32x1280xf32>
    %29 = arith.maximumf %26, %28 : vector<32x1280xf32>
    %c2_21 = arith.constant 2 : index
    %c0_22 = arith.constant 0 : index
    %c0_23 = arith.constant 0 : index
    %30 = vector.load %arg3[%c2_21, %c0_22, %c0_23] : memref<4x32x32xf32, #tpu.memory_space<vmem>>, vector<1x32x32xf32>
    %31 = vector.shape_cast %30 : vector<1x32x32xf32> to vector<32x32xf32>
    %cst_24 = arith.constant dense<0.000000e+00> : vector<32x1280xf32>
    %32 = tpu.matmul %31, %29, %cst_24 {dimension_numbers = #tpu.dot_dimension_numbers<[1], [0], [0], [1], [0, 0, 1, 1], [], []>} : vector<32x32xf32>, vector<32x1280xf32>, vector<32x1280xf32> -> vector<32x1280xf32>
    %c0_25 = arith.constant 0 : index
    %c3 = arith.constant 3 : index
    %33 = vector.load %arg4[%c0_25, %c3] : memref<32x5xf32, #tpu.memory_space<vmem>>, vector<32x1xf32>
    %34 = vector.broadcast %33 : vector<32x1xf32> to vector<32x1280xf32>
    %35 = arith.addf %32, %34 : vector<32x1280xf32>
    %cst_26 = arith.constant 1.000000e-01 : f32
    %36 = vector.broadcast %cst_26 : f32 to vector<32x1280xf32>
    %37 = arith.mulf %36, %35 : vector<32x1280xf32>
    %38 = arith.maximumf %35, %37 : vector<32x1280xf32>
    %c3_27 = arith.constant 3 : index
    %c0_28 = arith.constant 0 : index
    %c0_29 = arith.constant 0 : index
    %39 = vector.load %arg3[%c3_27, %c0_28, %c0_29] : memref<4x32x32xf32, #tpu.memory_space<vmem>>, vector<1x32x32xf32>
    %40 = vector.shape_cast %39 : vector<1x32x32xf32> to vector<32x32xf32>
    %41 = vector.extract_strided_slice %40 {offsets = [0, 0], sizes = [1, 32], strides = [1, 1]} : vector<32x32xf32> to vector<1x32xf32>
    %cst_30 = arith.constant dense<0.000000e+00> : vector<1x1280xf32>
    %42 = tpu.matmul %41, %38, %cst_30 {dimension_numbers = #tpu.dot_dimension_numbers<[1], [0], [0], [1], [0, 0, 1, 1], [], []>} : vector<1x32xf32>, vector<32x1280xf32>, vector<1x1280xf32> -> vector<1x1280xf32>
    %c0_31 = arith.constant 0 : index
    %c4 = arith.constant 4 : index
    %43 = vector.load %arg4[%c0_31, %c4] : memref<32x5xf32, #tpu.memory_space<vmem>>, vector<1x1xf32>
    %44 = vector.broadcast %43 : vector<1x1xf32> to vector<1x1280xf32>
    %45 = arith.addf %42, %44 : vector<1x1280xf32>
    %c0_32 = arith.constant 0 : index
    %c0_33 = arith.constant 0 : index
    %46 = vector.load %arg5[%c0_32, %c0_33] : memref<1x1280xf32, #tpu.memory_space<vmem>>, vector<1x1280xf32>
    tpu.vector_store %arg5[%c0_32, %c0_33], %45 {strides = array<i32>} : memref<1x1280xf32, #tpu.memory_space<vmem>>, vector<1x1280xf32>,
    return
  }
  func.func @transform_0(%arg0: i32) -> (i32, i32) {
    %c0_i32 = arith.constant 0 : i32
    %c0_i32_0 = arith.constant 0 : i32
    return %c0_i32, %arg0 : i32, i32
  }
  func.func @transform_1(%arg0: i32) -> (i32, i32) {
    %c0_i32 = arith.constant 0 : i32
    %c0_i32_0 = arith.constant 0 : i32
    %c0_i32_1 = arith.constant 0 : i32
    return %c0_i32, %c0_i32_0 : i32, i32
  }
  func.func @transform_2(%arg0: i32) -> (i32, i32, i32) {
    %c0_i32 = arith.constant 0 : i32
    %c0_i32_0 = arith.constant 0 : i32
    %c0_i32_1 = arith.constant 0 : i32
    %c0_i32_2 = arith.constant 0 : i32
    return %c0_i32, %c0_i32_0, %c0_i32_1 : i32, i32, i32
  }
  func.func @transform_3(%arg0: i32) -> (i32, i32) {
    %c0_i32 = arith.constant 0 : i32
    %c0_i32_0 = arith.constant 0 : i32
    %c0_i32_1 = arith.constant 0 : i32
    return %c0_i32, %c0_i32_0 : i32, i32
  }
  func.func @transform_4(%arg0: i32) -> (i32, i32) {
    %c0_i32 = arith.constant 0 : i32
    %c0_i32_0 = arith.constant 0 : i32
    return %c0_i32, %arg0 : i32, i32
  }
}

</mosaic_0001>

<bundles_post_ra>
// kernel: relu_network_forward.1
= control target key start
LH: loop header
LB: loop body
LE: loop exit
PB: predicated region body
PF: predicated region fallthrough
CT: control target
= control target key end

     0   :  { %s3747_s15 = smov 0   ;;  %s4692_s0 = inlined_call_operand.vmem [shape: f32[2,2560], index: 0, kind: input, shape index: {}]   ;;  %s4693_s1 = inlined_call_operand.vmem [shape: f32[32,4], index: 1, kind: input, shape index: {}]   ;;  %s4694_s2 = inlined_call_operand.vmem [shape: f32[4,32,32], index: 2, kind: input, shape index: {}]   ;;  %s4695_s3 = inlined_call_operand.vmem [shape: f32[32,5], index: 3, kind: input, shape index: {}]   ;;  %s4696_s4 = inlined_call_operand.vmem [shape: f32[1,2560], index: 4, kind: output, shape index: {}]  }
   0x1 LB: > { %s3531_s16 = sadd.s32 4294967295, %s3711_s15   ;;  %p3535_p0 = scmp.ge.s32.totalorder %s3711_s15, 1  ;;  %s3711_s15 = sphi %s3747_s15, %s14_s15  }
   0x2   : > { %p163_p1 = scmp.lt.s32.totalorder %s3711_s15, 3 }
   0x4   : > { %p164_p2 = pnand %p3535_p0, %p163_p1 }
   0x6   : > { %167 = sbr.rel (%p164_p2) target bundleno = 1147 (0x47b), region = 36 }
   0xb   : > { %s188_s17 = smul.u32 10, %s3531_s16  ;;  %v4697_v0 = vlaneseq  ;;  %v3713_v1 = vmov 1983009808   ;;  %v4698_v4 = vmov 0.0   ;;  %v3763_v5 = vld [vmem:[%s4695_s3 + $0x8] sm:$0xff]  ;;  %v3715_v7 = vmov 0  }
   0xc   : > { %v235_v2 = vunpack.c.l.s4 %v3713_v1  ;;  %373 = vmatprep.mubr.f32.mxu0 %v4698_v4  ;;  %391 = vmatprep.mubr.f32.mxu1 %v4698_v4  ;;  %v3768_v8 = vld [vmem:[%s4695_s3 + $0x18] sm:$0xff]  ;;  %v3778_v10 = vld [vmem:[%s4695_s3] sm:$0xff]  ;;  %v3783_v11 = vld [vmem:[%s4695_s3 + $0x10] sm:$0xff]  ;;  %vm288_vm0 = vcmask 1041408   ;;  %vm275_vm1 = vcmask 15360   ;;  %s3716_s12 = smov 126  }
   0xd   : > { %p189_p3 = scmp.lt.s32.totalorder %s188_s17, 19  ;;  %v3756_v3 = vshrl.u32 %v4697_v0, 7  ;;  %3694 = vset.pattern.permute.xlu1 %v3715_v7  ;;  %3693 = vset.pattern.permute.xlu0 %v3715_v7  ;;  %v202_v21 = vld [vmem:[%s4693_s1] sm:$0xff]  ;;  %v3809_v22 = vld [vmem:[%s4693_s1 + $0x18] sm:$0xff]  ;;  %v203_v27 = vld [vmem:[%s4693_s1 + $0x8] sm:$0xff]  ;;  %v3717_v30 = vmov 1  }
   0xe   : > { %v236_v6 = vunpack.c.0.s8 %v235_v2  ;;  %217 = vperm.xlu1 %3694, %v3763_v5   ;;  %227 = vperm.xlu0 %3693, %v3768_v8   ;;  %v204_v29 = vld [vmem:[%s4693_s1 + $0x10] sm:$0xff]  ;;  %vm862_vm2 = vcmask 261120  }
   0xf   : > { %4701 = vst [vmem:[#allocation2_spill] sm:$0xff] %v3756_v3  ;;  %s4720_s17 = smov (!%p189_p3, %s188_s17), 19 }
  0x10   : > { %v239_v9 = vsub.s32 %v236_v6, %v3756_v3  ;;  %s3536_s26 = sshll.u32 %s4720_s17, 1 }
  0x11   : > { %s192_s29 = scalar_lea.vmem %s4692_s0, %s3536_s26 }
  0x12   : > { %v199_v12 = vld [vmem:[%s192_s29] sm:$0xff]  ;;  %v200_v13 = vld [vmem:[%s192_s29 + $0x8] sm:$0xff]  ;;  %212 = vperm.xlu1 %3694, %v3778_v10   ;;  %222 = vperm.xlu0 %3693, %v3783_v11   ;;  %v3834_v26 = vld.sshfl [vmem:[%s192_s29 + $0x10] sm:$0x33 pattern:$0x76325410]  ;;  %s197_s29 = scalar_lea.vmem %s4696_s4, %s4720_s17 }
  0x13   : > { %v3791_v14 = vrot.slane %v199_v12, %v239_v9  ;;  %v233_v15 = vcombine.high %v199_v12, %v199_v12  ;;  %v250_v16 = vcombine.high %v200_v13, %v200_v13  ;;  %v3793_v17 = vrot.slane %v200_v13, %v239_v9 }
  0x14   : > { %v3851_v28 = vcombine.high %v3834_v26, %v3834_v26 }
  0x15   : > { %v3797_v18 = vcombine.high %v3791_v14, %v3791_v14  ;;  %v3799_v19 = vrot.slane %v233_v15, %v239_v9  ;;  %v3801_v20 = vrot.slane %v250_v16, %v239_v9  ;;  %v3825_v24 = vcombine.high %v3793_v17, %v3793_v17 }
  0x16   : > { %1413 = vrot.lane.b32.xlu0 %v202_v21, %s3716_s12  ;;  %1415 = vrot.lane.b32.xlu1 %v203_v27, %s3716_s12 }
  0x17   : > { %3538 = vmatprep.subr.msk.mxu0 %vm288_vm0, %v3797_v18  ;;  %3674 = vmatprep.subr.msk.mxu1 %vm288_vm0, %v3797_v18  ;;  %v3817_v23 = vcombine.high %v3799_v19, %v3799_v19  ;;  %v3829_v25 = vcombine.high %v3801_v20, %v3801_v20 }
  0x18   : > { %3539 = vmatpush1.msk.msra.mxu0 %vm288_vm0, %v3791_v14  ;;  %3675 = vmatpush1.msk.msra.mxu1 %vm288_vm0, %v3791_v14 }
  0x19   : > { %3540 = vmatmul.mubr.msk.f32.vlgmr.msra.gmra.mxu0 %vm275_vm1, %v202_v21  ;;  %3543 = vmatmul.mubr.msk.f32.vlgmr.msra.gmra.mxu1 %vm275_vm1, %v3809_v22 }
  0x1a   : > { %3544 = vmatprep.subr.msk.mxu1 %vm288_vm0, %v3817_v23  ;;  %379 = vmatprep.mubr.f32.mxu0 %v4698_v4 }
  0x1b   : > { %3545 = vmatpush1.msk.msra.mxu1 %vm288_vm0, %v3799_v19  ;;  %462 = vmatprep.mubr.f32.mxu1 %v4698_v4 }
  0x1c   : > { %3550 = vmatprep.subr.msk.mxu0 %vm288_vm0, %v3825_v24  ;;  %3556 = vmatprep.subr.msk.mxu1 %vm288_vm0, %v3829_v25 }
  0x1d   : > { %3541 = vmatmul.mubr.msk.f32.gmra.mxu0 %vm275_vm1, %v203_v27  ;;  %3546 = vmatmul.mubr.msk.f32.vlgmr.msra.gmra.mxu1 %vm275_vm1, %v202_v21 }
  0x1e   : > { %385 = vmatprep.mubr.f32.mxu0 %v4698_v4  ;;  %468 = vmatprep.mubr.f32.mxu1 %v4698_v4 }
  0x1f   : > { %3551 = vmatpush1.msk.msra.mxu0 %vm288_vm0, %v3793_v17  ;;  %3557 = vmatpush1.msk.msra.mxu1 %vm288_vm0, %v3801_v20 }
  0x20   : > { %3562 = vmatprep.subr.msk.mxu0 %vm288_vm0, %v3851_v28  ;;  %1417 = vrot.lane.b32.xlu0 %v204_v29, %s3716_s12 }
  0x21   : > { %3542 = vmatmul.mubr.msk.f32.gmra.mxu0 %vm275_vm1, %v204_v29  ;;  %3547 = vmatmul.mubr.msk.f32.gmra.mxu1 %vm275_vm1, %v203_v27 }
  0x22   : > { %474 = vmatprep.mubr.f32.mxu1 %v4698_v4  ;;  %551 = vmatprep.mubr.f32.mxu0 %v4698_v4 }
  0x23   : > { %1419 = vrot.lane.b32.xlu1 %v3809_v22, %s3716_s12  ;;  %3695 = vset.pattern.permute.xlu0 %v3717_v30 }
  0x24   : > { %3696 = vset.pattern.permute.xlu1 %v3717_v30  ;;  %859 = vperm.xlu0 %3695, %v3768_v8  }
  0x25   : > { %3548 = vmatmul.mubr.msk.f32.gmra.mxu1 %vm275_vm1, %v204_v29  ;;  %3552 = vmatmul.mubr.msk.f32.vlgmr.msra.gmra.mxu0 %vm275_vm1, %v202_v21 }
  0x26   : > { %480 = vmatprep.mubr.f32.mxu1 %v4698_v4  ;;  %557 = vmatprep.mubr.f32.mxu0 %v4698_v4 }
  0x27   : > { %3563 = vmatpush1.msk.msra.mxu0 %vm288_vm0, %v3834_v26  ;;  %854 = vperm.xlu1 %3696, %v3783_v11  }
  0x28   : > { %844 = vperm.xlu0 %3695, %v3778_v10  }
  0x29   : > { %3549 = vmatmul.mubr.msk.f32.gmra.mxu1 %vm275_vm1, %v3809_v22  ;;  %3553 = vmatmul.mubr.msk.f32.gmra.mxu0 %vm275_vm1, %v203_v27 }
  0x2a   : > { %563 = vmatprep.mubr.f32.mxu0 %v4698_v4  ;;  %640 = vmatprep.mubr.f32.mxu1 %v4698_v4 }
  0x2b   : > { %849 = vperm.xlu1 %3696, %v3763_v5  }
  0x2d   : > { %3554 = vmatmul.mubr.msk.f32.gmra.mxu0 %vm275_vm1, %v204_v29  ;;  %3558 = vmatmul.mubr.msk.f32.vlgmr.msra.gmra.mxu1 %vm275_vm1, %v202_v21 }
  0x2e   : > { %569 = vmatprep.mubr.f32.mxu0 %v4698_v4  ;;  %646 = vmatprep.mubr.f32.mxu1 %v4698_v4 }
  0x31   : > { %3555 = vmatmul.mubr.msk.f32.gmra.mxu0 %vm275_vm1, %v3809_v22  ;;  %3559 = vmatmul.mubr.msk.f32.gmra.mxu1 %vm275_vm1, %v203_v27 }
  0x32   : > { %652 = vmatprep.mubr.f32.mxu1 %v4698_v4  ;;  %729 = vmatprep.mubr.f32.mxu0 %v4698_v4 }
  0x35   : > { %3560 = vmatmul.mubr.msk.f32.gmra.mxu1 %vm275_vm1, %v204_v29  ;;  %3564 = vmatmul.mubr.msk.f32.vlgmr.msra.gmra.mxu0 %vm275_vm1, %v202_v21 }
  0x36   : > { %658 = vmatprep.mubr.f32.mxu1 %v4698_v4  ;;  %735 = vmatprep.mubr.f32.mxu0 %v4698_v4 }
  0x39   : > { %3561 = vmatmul.mubr.msk.f32.gmra.mxu1 %vm275_vm1, %v3809_v22  ;;  %3565 = vmatmul.mubr.msk.f32.gmra.mxu0 %vm275_vm1, %v203_v27 }
  0x3a   : > { %741 = vmatprep.mubr.f32.mxu0 %v4698_v4  ;;  %939 = vmatprep.mubr.f32.mxu1 %v4698_v4 }
  0x3d   : > { %3566 = vmatmul.mubr.msk.f32.gmra.mxu0 %vm275_vm1, %v204_v29 }
  0x3e   : > { %747 = vmatprep.mubr.f32.mxu0 %v4698_v4 }
  0x41   : > { %3567 = vmatmul.mubr.msk.f32.gmra.mxu0 %vm275_vm1, %v3809_v22 }
  0x42   : > { %1028 = vmatprep.mubr.f32.mxu0 %v4698_v4 }
  0x89   : > { %v3909_v31 = vpop.permute.xlu0 %227  ;;  %v3912_v37 = vpop.permute.xlu1 %217 }
  0x8d   : > { %v3915_v43 = vpop.permute.xlu0 %222  ;;  %v3917_v50 = vpop.permute.xlu1 %212 }
  0xd9   : > { %v375_v32 = vpop.f32.mrf.mxu0  ;;  %v393_v33 = vpop.f32.mrf.mxu1 }
  0xda   : > { %v394_v34 = vadd.f32 %v393_v33, %v3909_v31  ;;  %v376_v58 = vadd.f32 %v375_v32, %v3917_v50 }
  0xdb   : > { %v377_v35 = vpop.f32.mrf.mxu0  ;;  %v395_v36 = vpop.f32.mrf.mxu1 }
  0xdc   : > { %v396_v38 = vadd.f32 %v395_v36, %v3909_v31  ;;  %v784_v39 = vmul.f32 0.1, %v394_v34  ;;  %v378_v56 = vadd.f32 %v377_v35, %v3917_v50  ;;  %v754_v8 = vmul.f32 0.1, %v376_v58 }
  0xdd   : > { %v381_v40 = vpop.f32.mrf.mxu0  ;;  %v464_v41 = vpop.f32.mrf.mxu1 }
  0xde   : > { %v785_v42 = vmul.f32 0.1, %v396_v38  ;;  %v824_v46 = vmax.f32 %v394_v34, %v784_v39  ;;  %v382_v53 = vadd.f32 %v381_v40, %v3912_v37  ;;  %v755_v6 = vmul.f32 0.1, %v378_v56  ;;  %v3940_v39 = vld [vmem:[%s4694_s2] sm:$0xff] }
  0xdf   : > { %v383_v44 = vpop.f32.mrf.mxu0  ;;  %v466_v45 = vpop.f32.mrf.mxu1  ;;  %v794_v33 = vmax.f32 %v376_v58, %v754_v8 }
  0xe0   : > { %v825_v47 = vmax.f32 %v396_v38, %v785_v42  ;;  %v384_v51 = vadd.f32 %v383_v44, %v3912_v37  ;;  %v764_v1 = vmul.f32 0.1, %v382_v53  ;;  %v795_v29 = vmax.f32 %v378_v56, %v755_v6 }
  0xe1   : > { %v387_v48 = vpop.f32.mrf.mxu0  ;;  %v470_v49 = vpop.f32.mrf.mxu1  ;;  %v467_v40 = vadd.f32 %v466_v45, %v3917_v50 }
  0xe2   : > { %v388_v52 = vadd.f32 %v387_v48, %v3915_v43  ;;  %899 = vmatprep.subr.mxu1 %v825_v47  ;;  %v765_v62 = vmul.f32 0.1, %v384_v51  ;;  %v804_v16 = vmax.f32 %v382_v53, %v764_v1  ;;  %v471_v34 = vadd.f32 %v470_v49, %v3912_v37 }
  0xe3   : > { %v389_v54 = vpop.f32.mrf.mxu0  ;;  %v472_v55 = vpop.f32.mrf.mxu1  ;;  %900 = vmatpush1.msra.mxu1 %v824_v46  ;;  %v465_v46 = vadd.f32 %v464_v41, %v3917_v50  ;;  %v3954_v41 = vld [vmem:[%s4694_s2 + $0x8] sm:$0xff]  ;;  %v757_v45 = vmul.f32 0.1, %v467_v40 }
  0xe4   : > { %v390_v57 = vadd.f32 %v389_v54, %v3915_v43  ;;  %v774_v59 = vmul.f32 0.1, %v388_v52  ;;  %v805_v12 = vmax.f32 %v384_v51, %v765_v62  ;;  %v473_v30 = vadd.f32 %v472_v55, %v3912_v37 }
  0xe5   : > { %v476_v60 = vpop.f32.mrf.mxu1  ;;  %v3925_v61 = vpop.f32.mrf.mxu0  ;;  %v766_v53 = vmul.f32 0.1, %v471_v34 }
  0xe6   : > { %v775_v63 = vmul.f32 0.1, %v390_v57  ;;  %v814_v9 = vmax.f32 %v388_v52, %v774_v59  ;;  %v477_v21 = vadd.f32 %v476_v60, %v3915_v43  ;;  %v767_v51 = vmul.f32 0.1, %v473_v30 }
  0xe7   : > { %v478_v2 = vpop.f32.mrf.mxu1  ;;  %v3927_v5 = vpop.f32.mrf.mxu0  ;;  %v756_v60 = vmul.f32 0.1, %v465_v46 }
  0xe8   : > { %v815_v7 = vmax.f32 %v390_v57, %v775_v63  ;;  %v479_v13 = vadd.f32 %v478_v2, %v3915_v43  ;;  %v776_v47 = vmul.f32 0.1, %v477_v21  ;;  %v807_v6 = vmax.f32 %v473_v30, %v767_v51 }
  0xe9   : > { %v482_v10 = vpop.f32.mrf.mxu1  ;;  %v559_v11 = vpop.f32.mrf.mxu0  ;;  %v554_v30 = vadd.f32 %v3925_v61, %v3917_v50  ;;  %v3986_v61 = vld [vmem:[%s4694_s2 + $0x18] sm:$0xff] }
  0xea   : > { %v483_v15 = vadd.f32 %v482_v10, %v3909_v31  ;;  %901 = vmatprep.subr.mxu1 %v815_v7  ;;  %v777_v42 = vmul.f32 0.1, %v479_v13  ;;  %v816_v62 = vmax.f32 %v477_v21, %v776_v47  ;;  %v560_v10 = vadd.f32 %v559_v11, %v3912_v37 }
  0xeb   : > { %v484_v22 = vpop.f32.mrf.mxu1  ;;  %v561_v27 = vpop.f32.mrf.mxu0  ;;  %902 = vmatpush1.msra.mxu1 %v814_v9  ;;  %v806_v9 = vmax.f32 %v471_v34, %v766_v53  ;;  %v797_v21 = vmax.f32 %v467_v40, %v757_v45  ;;  %v796_v11 = vmax.f32 %v465_v46, %v756_v60  ;;  %v758_v51 = vmul.f32 0.1, %v554_v30 }
  0xec   : > { %v485_v32 = vadd.f32 %v484_v22, %v3909_v31  ;;  %903 = vmatprep.subr.mxu1 %v805_v12  ;;  %v786_v35 = vmul.f32 0.1, %v483_v15  ;;  %v817_v57 = vmax.f32 %v479_v13, %v777_v42  ;;  %v562_v7 = vadd.f32 %v561_v27, %v3912_v37 }
  0xed   : > { %v565_v36 = vpop.f32.mrf.mxu0  ;;  %v3935_v38 = vpop.f32.mrf.mxu1  ;;  %904 = vmatpush1.msra.mxu1 %v804_v16  ;;  %v3970_v16 = vld [vmem:[%s4694_s2 + $0x10] sm:$0xff]  ;;  %v556_v22 = vadd.f32 %v3927_v5, %v3917_v50  ;;  %v768_v40 = vmul.f32 0.1, %v560_v10 }
  0xee   : > { %v787_v44 = vmul.f32 0.1, %v485_v32  ;;  %905 = vmatprep.subr.mxu1 %v795_v29  ;;  %v826_v54 = vmax.f32 %v483_v15, %v786_v35  ;;  %v566_v63 = vadd.f32 %v565_v36, %v3915_v43  ;;  %v769_v35 = vmul.f32 0.1, %v562_v7 }
  0xef   : > { %v567_v48 = vpop.f32.mrf.mxu0  ;;  %v3944_v49 = vpop.f32.mrf.mxu1  ;;  %906 = vmatpush1.msra.mxu1 %v794_v33  ;;  %v759_v46 = vmul.f32 0.1, %v556_v22 }
  0xf0   : > { %v827_v52 = vmax.f32 %v485_v32, %v787_v44  ;;  %3568 = vmatmul.mubr.msk.f32.vlgmr.msra.gmra.mxu1 %vm862_vm2, %v3940_v39  ;;  %v568_v58 = vadd.f32 %v567_v48, %v3915_v43  ;;  %v778_v32 = vmul.f32 0.1, %v566_v63  ;;  %v809_v45 = vmax.f32 %v562_v7, %v769_v35 }
  0xf1   : > { %v571_v55 = vpop.f32.mrf.mxu0  ;;  %v3948_v56 = vpop.f32.mrf.mxu1  ;;  %945 = vmatprep.mubr.f32.mxu1 %v4698_v4 }
  0xf2   : > { %v572_v59 = vadd.f32 %v571_v55, %v3909_v31  ;;  %988 = vmatprep.subr.mxu0 %v827_v52  ;;  %v779_v27 = vmul.f32 0.1, %v568_v58  ;;  %v818_v52 = vmax.f32 %v566_v63, %v778_v32  ;;  %v799_v63 = vmax.f32 %v556_v22, %v759_v46 }
  0xf3   : > { %v573_v1 = vpop.f32.mrf.mxu0  ;;  %v650_v2 = vpop.f32.mrf.mxu1  ;;  %989 = vmatpush1.msra.mxu0 %v826_v54 }
  0xf4   : > { %v574_v8 = vadd.f32 %v573_v1, %v3909_v31  ;;  %3569 = vmatmul.mubr.msk.f32.gmra.mxu1 %vm862_vm2, %v3954_v41  ;;  %990 = vmatprep.subr.mxu0 %v817_v57  ;;  %v788_v12 = vmul.f32 0.1, %v572_v59  ;;  %v819_v47 = vmax.f32 %v568_v58, %v779_v27  ;;  %v651_v60 = vadd.f32 %v650_v2, %v3912_v37 }
  0xf5   : > { %v654_v13 = vpop.f32.mrf.mxu1  ;;  %v3964_v15 = vpop.f32.mrf.mxu0  ;;  %991 = vmatpush1.msra.mxu0 %v816_v62  ;;  %951 = vmatprep.mubr.f32.mxu1 %v4698_v4  ;;  %v649_v1 = vadd.f32 %v3948_v56, %v3912_v37 }
  0xf6   : > { %v789_v29 = vmul.f32 0.1, %v574_v8  ;;  %992 = vmatprep.subr.mxu0 %v807_v6  ;;  %v828_v5 = vmax.f32 %v572_v59, %v788_v12  ;;  %v655_v57 = vadd.f32 %v654_v13, %v3915_v43  ;;  %v808_v59 = vmax.f32 %v560_v10, %v768_v40 }
  0xf7   : > { %v656_v33 = vpop.f32.mrf.mxu1  ;;  %v3976_v34 = vpop.f32.mrf.mxu0  ;;  %993 = vmatpush1.msra.mxu0 %v806_v9  ;;  %v645_v9 = vadd.f32 %v3944_v49, %v3917_v50  ;;  %v643_v12 = vadd.f32 %v3935_v38, %v3917_v50  ;;  %v770_v27 = vmul.f32 0.1, %v649_v1 }
  0xf8   : > { %v829_v36 = vmax.f32 %v574_v8, %v789_v29  ;;  %3570 = vmatmul.mubr.msk.f32.gmra.mxu1 %vm862_vm2, %v3970_v16  ;;  %994 = vmatprep.subr.mxu0 %v797_v21  ;;  %v657_v53 = vadd.f32 %v656_v33, %v3915_v43  ;;  %v798_v8 = vmax.f32 %v554_v30, %v758_v51  ;;  %v780_v13 = vmul.f32 0.1, %v655_v57 }
  0xf9   : > { %v660_v42 = vpop.f32.mrf.mxu1  ;;  %v3980_v44 = vpop.f32.mrf.mxu0  ;;  %995 = vmatpush1.msra.mxu0 %v796_v11  ;;  %957 = vmatprep.mubr.f32.mxu1 %v4698_v4  ;;  %v771_v21 = vmul.f32 0.1, %v651_v60  ;;  %v761_v49 = vmul.f32 0.1, %v645_v9  ;;  %v760_v33 = vmul.f32 0.1, %v643_v12 }
  0xfa   : > { %v661_v48 = vadd.f32 %v660_v42, %v3909_v31  ;;  %3572 = vmatmul.mubr.msk.f32.vlgmr.msra.gmra.mxu0 %vm862_vm2, %v3940_v39  ;;  %1077 = vmatprep.subr.mxu1 %v829_v36  ;;  %v781_v10 = vmul.f32 0.1, %v657_v53  ;;  %v820_v35 = vmax.f32 %v655_v57, %v780_v13  ;;  %v810_v42 = vmax.f32 %v649_v1, %v770_v27 }
  0xfb   : > { %v662_v54 = vpop.f32.mrf.mxu1  ;;  %v739_v55 = vpop.f32.mrf.mxu0  ;;  %1078 = vmatpush1.msra.mxu1 %v828_v5  ;;  %1034 = vmatprep.mubr.f32.mxu0 %v4698_v4  ;;  %v811_v5 = vmax.f32 %v651_v60, %v771_v21  ;;  %v801_v51 = vmax.f32 %v645_v9, %v761_v49 }
  0xfc   : > { %v663_v58 = vadd.f32 %v662_v54, %v3909_v31  ;;  %3571 = vmatmul.mubr.msk.f32.gmra.mxu1 %vm862_vm2, %v3986_v61  ;;  %1079 = vmatprep.subr.mxu1 %v819_v47  ;;  %v790_v6 = vmul.f32 0.1, %v661_v48  ;;  %v821_v30 = vmax.f32 %v657_v53, %v781_v10  ;;  %v740_v46 = vadd.f32 %v739_v55, %v3912_v37 }
  0xfd   : > { %v743_v62 = vpop.f32.mrf.mxu0  ;;  %1080 = vmatpush1.msra.mxu1 %v818_v52  ;;  %1117 = vmatprep.mubr.f32.mxu1 %v4698_v4  ;;  %v734_v53 = vadd.f32 %v3976_v34, %v3917_v50 }
  0xfe   : > { %v791_v7 = vmul.f32 0.1, %v663_v58  ;;  %3573 = vmatmul.mubr.msk.f32.gmra.mxu0 %vm862_vm2, %v3954_v41  ;;  %1081 = vmatprep.subr.mxu1 %v809_v45  ;;  %v830_v29 = vmax.f32 %v661_v48, %v790_v6  ;;  %v744_v36 = vadd.f32 %v743_v62, %v3915_v43  ;;  %v732_v45 = vadd.f32 %v3964_v15, %v3917_v50 }
  0xff   : > { %v745_v2 = vpop.f32.mrf.mxu0  ;;  %1082 = vmatpush1.msra.mxu1 %v808_v59  ;;  %1040 = vmatprep.mubr.f32.mxu0 %v4698_v4  ;;  %v763_v34 = vmul.f32 0.1, %v734_v53 }
 0x100   : > { %v831_v56 = vmax.f32 %v663_v58, %v791_v7  ;;  %1083 = vmatprep.subr.mxu1 %v799_v63  ;;  %v746_v38 = vadd.f32 %v745_v2, %v3915_v43  ;;  %v738_v43 = vadd.f32 %v3980_v44, %v3912_v37  ;;  %v782_v54 = vmul.f32 0.1, %v744_v36 }
 0x101   : > { %v749_v22 = vpop.f32.mrf.mxu0  ;;  %1084 = vmatpush1.msra.mxu1 %v798_v8  ;;  %v773_v37 = vmul.f32 0.1, %v740_v46  ;;  %v762_v50 = vmul.f32 0.1, %v732_v45  ;;  %v803_v62 = vmax.f32 %v734_v53, %v763_v34 }
 0x102   : > { %v750_v11 = vadd.f32 %v749_v22, %v3909_v31  ;;  %3574 = vmatmul.mubr.msk.f32.gmra.mxu0 %vm862_vm2, %v3970_v16  ;;  %3576 = vmatmul.mubr.msk.f32.vlgmr.msra.gmra.mxu1 %vm862_vm2, %v3940_v39  ;;  %v783_v52 = vmul.f32 0.1, %v746_v38  ;;  %v772_v57 = vmul.f32 0.1, %v738_v43  ;;  %v822_v59 = vmax.f32 %v744_v36, %v782_v54 }
 0x103   : > { %1166 = vmatprep.subr.mxu0 %v831_v56  ;;  %v751_v32 = vpop.f32.mrf.mxu0  ;;  %1046 = vmatprep.mubr.f32.mxu0 %v4698_v4  ;;  %v813_v15 = vmax.f32 %v740_v46, %v773_v37  ;;  %v802_v63 = vmax.f32 %v732_v45, %v762_v50 }
 0x104   : > { %v752_v40 = vadd.f32 %v751_v32, %v3909_v31  ;;  %1167 = vmatpush1.msra.mxu0 %v830_v29  ;;  %1123 = vmatprep.mubr.f32.mxu1 %v4698_v4  ;;  %v792_v47 = vmul.f32 0.1, %v750_v11  ;;  %v800_v31 = vmax.f32 %v643_v12, %v760_v33  ;;  %v823_v58 = vmax.f32 %v746_v38, %v783_v52 }
 0x105   : > { %1168 = vmatprep.subr.mxu0 %v821_v30  ;;  %v812_v60 = vmax.f32 %v738_v43, %v772_v57 }
 0x106   : > { %v793_v48 = vmul.f32 0.1, %v752_v40  ;;  %1169 = vmatpush1.msra.mxu0 %v820_v35  ;;  %3577 = vmatmul.mubr.msk.f32.gmra.mxu1 %vm862_vm2, %v3954_v41  ;;  %v832_v44 = vmax.f32 %v750_v11, %v792_v47 }
 0x107   : > { %3575 = vmatmul.mubr.msk.f32.gmra.mxu0 %vm862_vm2, %v3986_v61  ;;  %1170 = vmatprep.subr.mxu0 %v811_v5 }
 0x108   : > { %v833_v55 = vmax.f32 %v752_v40, %v793_v48  ;;  %1171 = vmatpush1.msra.mxu0 %v810_v42  ;;  %1129 = vmatprep.mubr.f32.mxu1 %v4698_v4 }
 0x109   : > { %1172 = vmatprep.subr.mxu0 %v801_v51  ;;  %1206 = vmatprep.mubr.f32.mxu0 %v4698_v4 }
 0x10a   : > { %1173 = vmatpush1.msra.mxu0 %v800_v31  ;;  %3578 = vmatmul.mubr.msk.f32.gmra.mxu1 %vm862_vm2, %v3970_v16 }
 0x10b   : > { %3580 = vmatmul.mubr.msk.f32.vlgmr.msra.gmra.mxu0 %vm862_vm2, %v3940_v39  ;;  %1255 = vmatprep.subr.mxu1 %v833_v55 }
 0x10c   : > { %1256 = vmatpush1.msra.mxu1 %v832_v44  ;;  %1135 = vmatprep.mubr.f32.mxu1 %v4698_v4 }
 0x10d   : > { %1257 = vmatprep.subr.mxu1 %v823_v58  ;;  %1212 = vmatprep.mubr.f32.mxu0 %v4698_v4 }
 0x10e   : > { %1258 = vmatpush1.msra.mxu1 %v822_v59  ;;  %3592 = vmatprep.subr.msk.mxu0 %vm288_vm0, %v3797_v18  ;;  %v1416_v18 = vpop.permute.xlu1 %1415 }
 0x10f   : > { %3579 = vmatmul.mubr.msk.f32.gmra.mxu1 %vm862_vm2, %v3986_v61  ;;  %3581 = vmatmul.mubr.msk.f32.gmra.mxu0 %vm862_vm2, %v3954_v41 }
 0x110   : > { %1259 = vmatprep.subr.mxu1 %v813_v15  ;;  %1218 = vmatprep.mubr.f32.mxu0 %v4698_v4 }
 0x111   : > { %1260 = vmatpush1.msra.mxu1 %v812_v60  ;;  %1295 = vmatprep.mubr.f32.mxu1 %v4698_v4 }
 0x112   : > { %1261 = vmatprep.subr.mxu1 %v803_v62  ;;  %3593 = vmatpush1.msk.msra.mxu0 %vm288_vm0, %v3791_v14  ;;  %v1414_v14 = vpop.permute.xlu0 %1413 }
 0x113   : > { %1262 = vmatpush1.msra.mxu1 %v802_v63  ;;  %3582 = vmatmul.mubr.msk.f32.gmra.mxu0 %vm862_vm2, %v3970_v16 }
 0x114   : > { %3584 = vmatmul.mubr.msk.f32.vlgmr.msra.gmra.mxu1 %vm862_vm2, %v3940_v39  ;;  %1224 = vmatprep.mubr.f32.mxu0 %v4698_v4 }
 0x115   : > { %1301 = vmatprep.mubr.f32.mxu1 %v4698_v4  ;;  %3598 = vmatprep.subr.msk.mxu1 %vm288_vm0, %v3817_v23  ;;  %v1420_v23 = vpop.permute.xlu1 %1419 }
 0x116   : > { %3604 = vmatprep.subr.msk.mxu0 %vm288_vm0, %v3825_v24  ;;  %3599 = vmatpush1.msk.msra.mxu1 %vm288_vm0, %v3799_v19  ;;  %v1418_v19 = vpop.permute.xlu0 %1417  ;;  %v4129_v24 = vld [vmem:[%s4695_s3 + $0x10] sm:$0xff] }
 0x117   : > { %3583 = vmatmul.mubr.msk.f32.gmra.mxu0 %vm862_vm2, %v3986_v61  ;;  %3610 = vmatprep.subr.msk.mxu1 %vm288_vm0, %v3829_v25  ;;  %v4136_v25 = vld [vmem:[%s4695_s3 + $0x8] sm:$0xff] }
 0x118   : > { %3585 = vmatmul.mubr.msk.f32.gmra.mxu1 %vm862_vm2, %v3954_v41  ;;  %1493 = vmatprep.mubr.f32.mxu0 %v4698_v4 }
 0x119   : > { %1307 = vmatprep.mubr.f32.mxu1 %v4698_v4 }
 0x11a   : > { %v4147_v6 = vpop.permute.xlu0 %859 }
 0x11b   : > { %3594 = vmatmul.mubr.msk.f32.vlgmr.msra.gmra.mxu0 %vm275_vm1, %v1414_v14 }
 0x11c   : > { %3586 = vmatmul.mubr.msk.f32.gmra.mxu1 %vm862_vm2, %v3970_v16  ;;  %1499 = vmatprep.mubr.f32.mxu0 %v4698_v4 }
 0x11d   : > { %1313 = vmatprep.mubr.f32.mxu1 %v4698_v4  ;;  %3605 = vmatpush1.msk.msra.mxu0 %vm288_vm0, %v3793_v17  ;;  %v4124_v17 = vld [vmem:[%s4695_s3 + $0x18] sm:$0xff] }
 0x11e   : > { %3616 = vmatprep.subr.msk.mxu0 %vm288_vm0, %v3851_v28  ;;  %v4154_v27 = vpop.permute.xlu0 %844 }
 0x11f   : > { %3595 = vmatmul.mubr.msk.f32.gmra.mxu0 %vm275_vm1, %v1416_v18 }
 0x120   : > { %3587 = vmatmul.mubr.msk.f32.gmra.mxu1 %vm862_vm2, %v3986_v61  ;;  %1505 = vmatprep.mubr.f32.mxu0 %v4698_v4  ;;  %v4145_v61 = vpop.permute.xlu1 %854 }
 0x121   : > { %1582 = vmatprep.mubr.f32.mxu1 %v4698_v4 }
 0x123   : > { %3596 = vmatmul.mubr.msk.f32.gmra.mxu0 %vm275_vm1, %v1418_v19 }
 0x124   : > { %1511 = vmatprep.mubr.f32.mxu0 %v4698_v4  ;;  %3600 = vmatmul.mubr.msk.f32.vlgmr.msra.gmra.mxu1 %vm275_vm1, %v1414_v14  ;;  %v4149_v2 = vpop.permute.xlu1 %849 }
 0x125   : > { %1588 = vmatprep.mubr.f32.mxu1 %v4698_v4  ;;  %3611 = vmatpush1.msk.msra.mxu1 %vm288_vm0, %v3801_v20  ;;  %v3718_v20 = vmov 2  }
 0x126   : > { %3697 = vset.pattern.permute.xlu1 %v3718_v20  ;;  %3698 = vset.pattern.permute.xlu0 %v3718_v20 }
 0x127   : > { %3597 = vmatmul.mubr.msk.f32.gmra.mxu0 %vm275_vm1, %v1420_v23  ;;  %2352 = vperm.xlu1 %3697, %v4124_v17  }
 0x128   : > { %1671 = vmatprep.mubr.f32.mxu0 %v4698_v4  ;;  %3601 = vmatmul.mubr.msk.f32.gmra.mxu1 %vm275_vm1, %v1416_v18 }
 0x129   : > { %1594 = vmatprep.mubr.f32.mxu1 %v4698_v4  ;;  %2347 = vperm.xlu0 %3698, %v4129_v24  }
 0x12b   : > { %3606 = vmatmul.mubr.msk.f32.vlgmr.msra.gmra.mxu0 %vm275_vm1, %v1414_v14  ;;  %2342 = vperm.xlu1 %3697, %v4136_v25  }
 0x12c   : > { %1677 = vmatprep.mubr.f32.mxu0 %v4698_v4  ;;  %3602 = vmatmul.mubr.msk.f32.gmra.mxu1 %vm275_vm1, %v1418_v19 }
 0x12d   : > { %1600 = vmatprep.mubr.f32.mxu1 %v4698_v4  ;;  %3617 = vmatpush1.msk.msra.mxu0 %vm288_vm0, %v3834_v26  ;;  %v4142_v26 = vld [vmem:[%s4695_s3] sm:$0xff] }
 0x12f   : > { %3607 = vmatmul.mubr.msk.f32.gmra.mxu0 %vm275_vm1, %v1416_v18  ;;  %2337 = vperm.xlu1 %3697, %v4142_v26  }
 0x130   : > { %1683 = vmatprep.mubr.f32.mxu0 %v4698_v4  ;;  %3603 = vmatmul.mubr.msk.f32.gmra.mxu1 %vm275_vm1, %v1420_v23 }
 0x131   : > { %1760 = vmatprep.mubr.f32.mxu1 %v4698_v4 }
 0x133   : > { %3608 = vmatmul.mubr.msk.f32.gmra.mxu0 %vm275_vm1, %v1418_v19 }
 0x134   : > { %1689 = vmatprep.mubr.f32.mxu0 %v4698_v4  ;;  %3612 = vmatmul.mubr.msk.f32.vlgmr.msra.gmra.mxu1 %vm275_vm1, %v1414_v14 }
 0x135   : > { %1766 = vmatprep.mubr.f32.mxu1 %v4698_v4 }
 0x137   : > { %3609 = vmatmul.mubr.msk.f32.gmra.mxu0 %vm275_vm1, %v1420_v23 }
 0x138   : > { %1849 = vmatprep.mubr.f32.mxu0 %v4698_v4  ;;  %3613 = vmatmul.mubr.msk.f32.gmra.mxu1 %vm275_vm1, %v1416_v18 }
 0x139   : > { %1772 = vmatprep.mubr.f32.mxu1 %v4698_v4 }
 0x13b   : > { %3618 = vmatmul.mubr.msk.f32.vlgmr.msra.gmra.mxu0 %vm275_vm1, %v1414_v14 }
 0x13c   : > { %1855 = vmatprep.mubr.f32.mxu0 %v4698_v4  ;;  %3614 = vmatmul.mubr.msk.f32.gmra.mxu1 %vm275_vm1, %v1418_v19 }
 0x13d   : > { %1778 = vmatprep.mubr.f32.mxu1 %v4698_v4 }
 0x13f   : > { %3619 = vmatmul.mubr.msk.f32.gmra.mxu0 %vm275_vm1, %v1416_v18 }
 0x140   : > { %1861 = vmatprep.mubr.f32.mxu0 %v4698_v4  ;;  %3615 = vmatmul.mubr.msk.f32.gmra.mxu1 %vm275_vm1, %v1420_v23 }
 0x141   : > { %1950 = vmatprep.mubr.f32.mxu1 %v4698_v4 }
 0x143   : > { %3620 = vmatmul.mubr.msk.f32.gmra.mxu0 %vm275_vm1, %v1418_v19  ;;  %v4173_v19 = vld [vmem:[%s4694_s2 + $0x20] sm:$0xff] }
 0x144   : > { %1867 = vmatprep.mubr.f32.mxu0 %v4698_v4 }
 0x147   : > { %3621 = vmatmul.mubr.msk.f32.gmra.mxu0 %vm275_vm1, %v1420_v23 }
 0x148   : > { %2039 = vmatprep.mubr.f32.mxu0 %v4698_v4 }
 0x1b0   : > { %v941_v28 = vpop.f32.mrf.mxu1 }
 0x1b1   : > { %v942_v36 = vadd.f32 %v941_v28, %v4154_v27 }
 0x1b2   : > { %v943_v39 = vpop.f32.mrf.mxu1 }
 0x1b3   : > { %v944_v32 = vadd.f32 %v943_v39, %v4154_v27  ;;  %v1320_v54 = vmul.f32 0.1, %v942_v36 }
 0x1b4   : > { %v947_v41 = vpop.f32.mrf.mxu1 }
 0x1b5   : > { %v948_v49 = vadd.f32 %v947_v41, %v4149_v2  ;;  %v1321_v31 = vmul.f32 0.1, %v944_v32  ;;  %v1360_v62 = vmax.f32 %v942_v36, %v1320_v54 }
 0x1b6   : > { %v949_v16 = vpop.f32.mrf.mxu1 }
 0x1b7   : > { %v950_v29 = vadd.f32 %v949_v16, %v4149_v2  ;;  %v1330_v48 = vmul.f32 0.1, %v948_v49  ;;  %v1361_v50 = vmax.f32 %v944_v32, %v1321_v31 }
 0x1b8   : > { %v953_v1 = vpop.f32.mrf.mxu1 }
 0x1b9   : > { %v954_v56 = vadd.f32 %v953_v1, %v4145_v61  ;;  %v1331_v46 = vmul.f32 0.1, %v950_v29  ;;  %v1370_v57 = vmax.f32 %v948_v49, %v1330_v48  ;;  %v4203_v48 = vld [vmem:[%s4694_s2 + $0x30] sm:$0xff] }
 0x1ba   : > { %v955_v7 = vpop.f32.mrf.mxu1  ;;  %v1030_v8 = vpop.f32.mrf.mxu0 }
 0x1bb   : > { %v956_v12 = vadd.f32 %v955_v7, %v4145_v61  ;;  %v1340_v40 = vmul.f32 0.1, %v954_v56  ;;  %v1371_v37 = vmax.f32 %v950_v29, %v1331_v46  ;;  %v1031_v7 = vadd.f32 %v1030_v8, %v4154_v27 }
 0x1bc   : > { %v959_v9 = vpop.f32.mrf.mxu1  ;;  %v1032_v10 = vpop.f32.mrf.mxu0 }
 0x1bd   : > { %v960_v13 = vadd.f32 %v959_v9, %v4147_v6  ;;  %v1341_v33 = vmul.f32 0.1, %v956_v12  ;;  %v1380_v55 = vmax.f32 %v954_v56, %v1340_v40  ;;  %v1033_v39 = vadd.f32 %v1032_v10, %v4154_v27  ;;  %v4188_v10 = vld [vmem:[%s4694_s2 + $0x28] sm:$0xff] }
 0x1be   : > { %v961_v21 = vpop.f32.mrf.mxu1  ;;  %v1036_v22 = vpop.f32.mrf.mxu0  ;;  %v1322_v32 = vmul.f32 0.1, %v1031_v7 }
 0x1bf   : > { %v962_v11 = vadd.f32 %v961_v21, %v4147_v6  ;;  %v1350_v30 = vmul.f32 0.1, %v960_v13  ;;  %v1381_v53 = vmax.f32 %v956_v12, %v1341_v33  ;;  %v1037_v23 = vadd.f32 %v1036_v22, %v4149_v2 }
 0x1c0   : > { %v1038_v38 = vpop.f32.mrf.mxu0  ;;  %v1323_v8 = vmul.f32 0.1, %v1033_v39 }
 0x1c1   : > { %v1351_v35 = vmul.f32 0.1, %v962_v11  ;;  %v1390_v51 = vmax.f32 %v960_v13, %v1350_v30  ;;  %v1039_v63 = vadd.f32 %v1038_v38, %v4149_v2  ;;  %v1332_v21 = vmul.f32 0.1, %v1037_v23 }
 0x1c2   : > { %v1042_v5 = vpop.f32.mrf.mxu0  ;;  %v4161_v42 = vpop.f32.mrf.mxu1  ;;  %v1363_v54 = vmax.f32 %v1033_v39, %v1323_v8 }
 0x1c3   : > { %v1391_v47 = vmax.f32 %v962_v11, %v1351_v35  ;;  %v1043_v15 = vadd.f32 %v1042_v5, %v4145_v61  ;;  %v1333_v13 = vmul.f32 0.1, %v1039_v63 }
 0x1c4   : > { %v1044_v43 = vpop.f32.mrf.mxu0  ;;  %v4163_v52 = vpop.f32.mrf.mxu1 }
 0x1c5   : > { %1910 = vmatprep.subr.mxu1 %v1391_v47  ;;  %v1045_v58 = vadd.f32 %v1044_v43, %v4145_v61  ;;  %v1342_v9 = vmul.f32 0.1, %v1043_v15  ;;  %v1373_v5 = vmax.f32 %v1039_v63, %v1333_v13 }
 0x1c6   : > { %v1125_v45 = vpop.f32.mrf.mxu1  ;;  %1911 = vmatpush1.msra.mxu1 %v1390_v51  ;;  %v1372_v51 = vmax.f32 %v1037_v23, %v1332_v21 }
 0x1c7   : > { %v1048_v44 = vpop.f32.mrf.mxu0  ;;  %1912 = vmatprep.subr.mxu1 %v1381_v53  ;;  %v1343_v41 = vmul.f32 0.1, %v1045_v58  ;;  %v1382_v33 = vmax.f32 %v1043_v15, %v1342_v9  ;;  %v1126_v43 = vadd.f32 %v1125_v45, %v4149_v2 }
 0x1c8   : > { %v1049_v34 = vadd.f32 %v1048_v44, %v4147_v6  ;;  %v1127_v59 = vpop.f32.mrf.mxu1  ;;  %1913 = vmatpush1.msra.mxu1 %v1380_v55  ;;  %v1122_v55 = vadd.f32 %v4163_v52, %v4154_v27 }
 0x1c9   : > { %v1050_v60 = vpop.f32.mrf.mxu0  ;;  %1914 = vmatprep.subr.mxu1 %v1371_v37  ;;  %v1383_v49 = vmax.f32 %v1045_v58, %v1343_v41  ;;  %v1128_v46 = vadd.f32 %v1127_v59, %v4149_v2  ;;  %v1362_v58 = vmax.f32 %v1031_v7, %v1322_v32  ;;  %v1334_v52 = vmul.f32 0.1, %v1126_v43 }
 0x1ca   : > { %v1051_v14 = vadd.f32 %v1050_v60, %v4147_v6  ;;  %v1131_v18 = vpop.f32.mrf.mxu1  ;;  %1915 = vmatpush1.msra.mxu1 %v1370_v57  ;;  %v1352_v20 = vmul.f32 0.1, %v1049_v34 }
 0x1cb   : > { %v4176_v28 = vpop.f32.mrf.mxu0  ;;  %1916 = vmatprep.subr.mxu1 %v1361_v50  ;;  %v1132_v35 = vadd.f32 %v1131_v18, %v4145_v61  ;;  %v1335_v45 = vmul.f32 0.1, %v1128_v46  ;;  %v1374_v21 = vmax.f32 %v1126_v43, %v1334_v52 }
 0x1cc   : > { %v1353_v16 = vmul.f32 0.1, %v1051_v14  ;;  %v1133_v1 = vpop.f32.mrf.mxu1  ;;  %1917 = vmatpush1.msra.mxu1 %v1360_v62  ;;  %v1392_v22 = vmax.f32 %v1049_v34, %v1352_v20  ;;  %v1120_v34 = vadd.f32 %v4161_v42, %v4154_v27  ;;  %v4220_v42 = vld [vmem:[%s4694_s2 + $0x38] sm:$0xff] }
 0x1cd   : > { %v4180_v12 = vpop.f32.mrf.mxu0  ;;  %3622 = vmatmul.mubr.msk.f32.vlgmr.msra.gmra.mxu1 %vm862_vm2, %v4173_v19  ;;  %v1134_v30 = vadd.f32 %v1133_v1, %v4145_v61  ;;  %v1344_v59 = vmul.f32 0.1, %v1132_v35  ;;  %v1375_v7 = vmax.f32 %v1128_v46, %v1335_v45 }
 0x1ce   : > { %v1393_v56 = vmax.f32 %v1051_v14, %v1353_v16  ;;  %1956 = vmatprep.mubr.f32.mxu1 %v4698_v4  ;;  %v1325_v14 = vmul.f32 0.1, %v1122_v55  ;;  %v1324_v39 = vmul.f32 0.1, %v1120_v34 }
 0x1cf   : > { %v1137_v29 = vpop.f32.mrf.mxu1  ;;  %v4190_v11 = vpop.f32.mrf.mxu0  ;;  %v1345_v37 = vmul.f32 0.1, %v1134_v30  ;;  %v1384_v41 = vmax.f32 %v1132_v35, %v1344_v59 }
 0x1d0   : > { %v1138_v38 = vadd.f32 %v1137_v29, %v4147_v6  ;;  %1999 = vmatprep.subr.mxu0 %v1393_v56  ;;  %v1365_v29 = vmax.f32 %v1122_v55, %v1325_v14  ;;  %v1215_v8 = vadd.f32 %v4190_v11, %v4149_v2  ;;  %v1364_v32 = vmax.f32 %v1120_v34, %v1324_v39 }
 0x1d1   : > { %v1139_v36 = vpop.f32.mrf.mxu1  ;;  %v1216_v40 = vpop.f32.mrf.mxu0  ;;  %2000 = vmatpush1.msra.mxu0 %v1392_v22  ;;  %3623 = vmatmul.mubr.msk.f32.gmra.mxu1 %vm862_vm2, %v4188_v10  ;;  %v1385_v18 = vmax.f32 %v1134_v30, %v1345_v37 }
 0x1d2   : > { %v1140_v47 = vadd.f32 %v1139_v36, %v4147_v6  ;;  %2001 = vmatprep.subr.mxu0 %v1383_v49  ;;  %1962 = vmatprep.mubr.f32.mxu1 %v4698_v4  ;;  %v1354_v31 = vmul.f32 0.1, %v1138_v38  ;;  %v1217_v22 = vadd.f32 %v1216_v40, %v4149_v2  ;;  %v1209_v36 = vadd.f32 %v4176_v28, %v4154_v27 }
 0x1d3   : > { %v1220_v53 = vpop.f32.mrf.mxu0  ;;  %2002 = vmatpush1.msra.mxu0 %v1382_v33  ;;  %v1211_v33 = vadd.f32 %v4180_v12, %v4154_v27 }
 0x1d4   : > { %v1355_v44 = vmul.f32 0.1, %v1140_v47  ;;  %v4208_v57 = vpop.f32.mrf.mxu1  ;;  %2003 = vmatprep.subr.mxu0 %v1373_v5  ;;  %v1394_v62 = vmax.f32 %v1138_v38, %v1354_v31  ;;  %v1221_v9 = vadd.f32 %v1220_v53, %v4145_v61  ;;  %v1337_v46 = vmul.f32 0.1, %v1217_v22 }
 0x1d5   : > { %v1222_v50 = vpop.f32.mrf.mxu0  ;;  %2004 = vmatpush1.msra.mxu0 %v1372_v51  ;;  %3624 = vmatmul.mubr.msk.f32.gmra.mxu1 %vm862_vm2, %v4203_v48  ;;  %v1327_v12 = vmul.f32 0.1, %v1211_v33 }
 0x1d6   : > { %v1395_v15 = vmax.f32 %v1140_v47, %v1355_v44  ;;  %v4214_v60 = vpop.f32.mrf.mxu1  ;;  %2005 = vmatprep.subr.mxu0 %v1363_v54  ;;  %1968 = vmatprep.mubr.f32.mxu1 %v4698_v4  ;;  %v1223_v16 = vadd.f32 %v1222_v50, %v4145_v61  ;;  %v1346_v40 = vmul.f32 0.1, %v1221_v9  ;;  %v1336_v47 = vmul.f32 0.1, %v1215_v8 }
 0x1d7   : > { %v1226_v63 = vpop.f32.mrf.mxu0  ;;  %2006 = vmatpush1.msra.mxu0 %v1362_v58  ;;  %v1326_v54 = vmul.f32 0.1, %v1209_v36  ;;  %v1377_v58 = vmax.f32 %v1217_v22, %v1337_v46 }
 0x1d8   : > { %v1227_v23 = vadd.f32 %v1226_v63, %v4147_v6  ;;  %v4223_v20 = vpop.f32.mrf.mxu1  ;;  %3626 = vmatmul.mubr.msk.f32.vlgmr.msra.gmra.mxu0 %vm862_vm2, %v4173_v19  ;;  %2088 = vmatprep.subr.mxu1 %v1395_v15  ;;  %v1347_v35 = vmul.f32 0.1, %v1223_v16  ;;  %v1386_v55 = vmax.f32 %v1221_v9, %v1346_v40  ;;  %v1376_v59 = vmax.f32 %v1215_v8, %v1336_v47 }
 0x1d9   : > { %v1228_v1 = vpop.f32.mrf.mxu0  ;;  %2089 = vmatpush1.msra.mxu1 %v1394_v62  ;;  %2045 = vmatprep.mubr.f32.mxu0 %v4698_v4  ;;  %v1367_v15 = vmax.f32 %v1211_v33, %v1327_v12  ;;  %v1300_v63 = vadd.f32 %v4214_v60, %v4154_v27 }
 0x1da   : > { %v1229_v13 = vadd.f32 %v1228_v1, %v4147_v6  ;;  %v1305_v56 = vpop.f32.mrf.mxu1  ;;  %3625 = vmatmul.mubr.msk.f32.gmra.mxu1 %vm862_vm2, %v4220_v42  ;;  %2090 = vmatprep.subr.mxu1 %v1385_v18  ;;  %v1356_v49 = vmul.f32 0.1, %v1227_v23  ;;  %v1387_v31 = vmax.f32 %v1223_v16, %v1347_v35  ;;  %v1298_v18 = vadd.f32 %v4208_v57, %v4154_v27 }
 0x1db   : > { %2091 = vmatpush1.msra.mxu1 %v1384_v41  ;;  %2128 = vmatprep.mubr.f32.mxu1 %v4698_v4  ;;  %v1306_v50 = vadd.f32 %v1305_v56, %v4149_v2  ;;  %v1329_v60 = vmul.f32 0.1, %v1300_v63  ;;  %v3719_v35 = vmov 3  }
 0x1dc   : > { %v1357_v30 = vmul.f32 0.1, %v1229_v13  ;;  %v1309_v38 = vpop.f32.mrf.mxu1  ;;  %3627 = vmatmul.mubr.msk.f32.gmra.mxu0 %vm862_vm2, %v4188_v10  ;;  %2092 = vmatprep.subr.mxu1 %v1375_v7  ;;  %v1396_v51 = vmax.f32 %v1227_v23, %v1356_v49  ;;  %v1328_v27 = vmul.f32 0.1, %v1298_v18 }
 0x1dd   : > { %2093 = vmatpush1.msra.mxu1 %v1374_v21  ;;  %2051 = vmatprep.mubr.f32.mxu0 %v4698_v4  ;;  %v1310_v37 = vadd.f32 %v1309_v38, %v4145_v61  ;;  %v1369_v7 = vmax.f32 %v1300_v63, %v1329_v60 }
 0x1de   : > { %v1397_v11 = vmax.f32 %v1229_v13, %v1357_v30  ;;  %v1311_v5 = vpop.f32.mrf.mxu1  ;;  %2094 = vmatprep.subr.mxu1 %v1365_v29  ;;  %v1368_v9 = vmax.f32 %v1298_v18, %v1328_v27  ;;  %3699 = vset.pattern.permute.xlu0 %v3719_v35 }
 0x1df   : > { %2095 = vmatpush1.msra.mxu1 %v1364_v32  ;;  %v1312_v53 = vadd.f32 %v1311_v5, %v4145_v61  ;;  %v1304_v61 = vadd.f32 %v4223_v20, %v4149_v2  ;;  %v1348_v14 = vmul.f32 0.1, %v1310_v37  ;;  %v1339_v2 = vmul.f32 0.1, %v1306_v50  ;;  %3700 = vset.pattern.permute.xlu1 %v3719_v35 }
 0x1e0   : > { %v1315_v43 = vpop.f32.mrf.mxu1  ;;  %3628 = vmatmul.mubr.msk.f32.gmra.mxu0 %vm862_vm2, %v4203_v48  ;;  %3630 = vmatmul.mubr.msk.f32.vlgmr.msra.gmra.mxu1 %vm862_vm2, %v4173_v19 }
 0x1e1   : > { %v1316_v28 = vadd.f32 %v1315_v43, %v4147_v6  ;;  %2177 = vmatprep.subr.mxu0 %v1397_v11  ;;  %2057 = vmatprep.mubr.f32.mxu0 %v4698_v4  ;;  %v1349_v52 = vmul.f32 0.1, %v1312_v53  ;;  %v1338_v39 = vmul.f32 0.1, %v1304_v61  ;;  %v1388_v16 = vmax.f32 %v1310_v37, %v1348_v14 }
 0x1e2   : > { %v1317_v44 = vpop.f32.mrf.mxu1  ;;  %2178 = vmatpush1.msra.mxu0 %v1396_v51  ;;  %2134 = vmatprep.mubr.f32.mxu1 %v4698_v4  ;;  %v1379_v57 = vmax.f32 %v1306_v50, %v1339_v2 }
 0x1e3   : > { %v1318_v34 = vadd.f32 %v1317_v44, %v4147_v6  ;;  %2179 = vmatprep.subr.mxu0 %v1387_v31  ;;  %v1358_v45 = vmul.f32 0.1, %v1316_v28  ;;  %v1366_v6 = vmax.f32 %v1209_v36, %v1326_v54  ;;  %v1389_v41 = vmax.f32 %v1312_v53, %v1349_v52  ;;  %2493 = vperm.xlu0 %3699, %v4124_v17   ;;  %v4369_v52 = vpop.permute.xlu1 %2352 }
 0x1e4   : > { %2180 = vmatpush1.msra.mxu0 %v1386_v55  ;;  %3631 = vmatmul.mubr.msk.f32.gmra.mxu1 %vm862_vm2, %v4188_v10  ;;  %v1378_v1 = vmax.f32 %v1304_v61, %v1338_v39  ;;  %v4303_v29 = vpop.f32.mrf.mxu1 }
 0x1e5   : > { %v1359_v62 = vmul.f32 0.1, %v1318_v34  ;;  %3629 = vmatmul.mubr.msk.f32.gmra.mxu0 %vm862_vm2, %v4220_v42  ;;  %2181 = vmatprep.subr.mxu0 %v1377_v58  ;;  %v1398_v20 = vmax.f32 %v1316_v28, %v1358_v45 }
 0x1e6   : > { %2182 = vmatpush1.msra.mxu0 %v1376_v59  ;;  %2140 = vmatprep.mubr.f32.mxu1 %v4698_v4 }
 0x1e7   : > { %v1399_v23 = vmax.f32 %v1318_v34, %v1359_v62  ;;  %2183 = vmatprep.subr.mxu0 %v1367_v15  ;;  %2217 = vmatprep.mubr.f32.mxu0 %v4698_v4 }
 0x1e8   : > { %2184 = vmatpush1.msra.mxu0 %v1366_v6  ;;  %3632 = vmatmul.mubr.msk.f32.gmra.mxu1 %vm862_vm2, %v4203_v48 }
 0x1e9   : > { %3634 = vmatmul.mubr.msk.f32.vlgmr.msra.gmra.mxu0 %vm862_vm2, %v4173_v19  ;;  %2266 = vmatprep.subr.mxu1 %v1399_v23  ;;  %v4373_v23 = vpop.permute.xlu1 %2342 }
 0x1ea   : > { %2267 = vmatpush1.msra.mxu1 %v1398_v20  ;;  %2146 = vmatprep.mubr.f32.mxu1 %v4698_v4 }
 0x1eb   : > { %2268 = vmatprep.subr.mxu1 %v1389_v41  ;;  %2223 = vmatprep.mubr.f32.mxu0 %v4698_v4 }
 0x1ec   : > { %2269 = vmatpush1.msra.mxu1 %v1388_v16  ;;  %2489 = vperm.xlu1 %3700, %v4129_v24   ;;  %v4375_v16 = vpop.permute.xlu0 %2347 }
 0x1ed   : > { %3633 = vmatmul.mubr.msk.f32.gmra.mxu1 %vm862_vm2, %v4220_v42  ;;  %3635 = vmatmul.mubr.msk.f32.gmra.mxu0 %vm862_vm2, %v4188_v10 }
 0x1ee   : > { %2270 = vmatprep.subr.mxu1 %v1379_v57  ;;  %2229 = vmatprep.mubr.f32.mxu0 %v4698_v4 }
 0x1ef   : > { %2271 = vmatpush1.msra.mxu1 %v1378_v1  ;;  %2306 = vmatprep.mubr.f32.mxu1 %v4698_v4 }
 0x1f0   : > { %2272 = vmatprep.subr.mxu1 %v1369_v7  ;;  %2481 = vperm.xlu0 %3699, %v4142_v26  }
 0x1f1   : > { %2273 = vmatpush1.msra.mxu1 %v1368_v9  ;;  %3636 = vmatmul.mubr.msk.f32.gmra.mxu0 %vm862_vm2, %v4203_v48 }
 0x1f2   : > { %3638 = vmatmul.mubr.msk.f32.vlgmr.msra.gmra.mxu1 %vm862_vm2, %v4173_v19  ;;  %2235 = vmatprep.mubr.f32.mxu0 %v4698_v4  ;;  %v4297_v19 = vpop.f32.mrf.mxu0 }
 0x1f3   : > { %2312 = vmatprep.mubr.f32.mxu1 %v4698_v4  ;;  %2485 = vperm.xlu1 %3700, %v4136_v25  }
 0x1f4   : > { %v4299_v13 = vpop.f32.mrf.mxu0 }
 0x1f5   : > { %3637 = vmatmul.mubr.msk.f32.gmra.mxu0 %vm862_vm2, %v4220_v42 }
 0x1f6   : > { %3639 = vmatmul.mubr.msk.f32.gmra.mxu1 %vm862_vm2, %v4188_v10  ;;  %2572 = vmatprep.mubr.f32.mxu0 %v4698_v4  ;;  %v4301_v56 = vpop.f32.mrf.mxu0 }
 0x1f7   : > { %2318 = vmatprep.mubr.f32.mxu1 %v4698_v4 }
 0x1f8   : > { %v1503_v10 = vpop.f32.mrf.mxu0 }
 0x1fa   : > { %3640 = vmatmul.mubr.msk.f32.gmra.mxu1 %vm862_vm2, %v4203_v48  ;;  %v1507_v21 = vpop.f32.mrf.mxu0  ;;  %v4305_v48 = vpop.f32.mrf.mxu1 }
 0x1fb   : > { %2324 = vmatprep.mubr.f32.mxu1 %v4698_v4 }
 0x1fc   : > { %v1509_v22 = vpop.f32.mrf.mxu0  ;;  %v4307_v30 = vpop.f32.mrf.mxu1 }
 0x1fe   : > { %3641 = vmatmul.mubr.msk.f32.gmra.mxu1 %vm862_vm2, %v4220_v42  ;;  %v1513_v8 = vpop.f32.mrf.mxu0  ;;  %v4311_v38 = vpop.f32.mrf.mxu1 }
 0x1ff   : > { %2661 = vmatprep.mubr.f32.mxu1 %v4698_v4 }
 0x200   : > { %v1515_v49 = vpop.f32.mrf.mxu0  ;;  %v4315_v33 = vpop.f32.mrf.mxu1 }
 0x202   : > { %v4309_v42 = vpop.f32.mrf.mxu0  ;;  %v4321_v40 = vpop.f32.mrf.mxu1 }
 0x204   : > { %v4313_v32 = vpop.f32.mrf.mxu0  ;;  %v4327_v5 = vpop.f32.mrf.mxu1 }
 0x206   : > { %v4319_v36 = vpop.f32.mrf.mxu0  ;;  %v4331_v47 = vpop.f32.mrf.mxu1 }
 0x208   : > { %v4325_v11 = vpop.f32.mrf.mxu0  ;;  %v4335_v17 = vpop.f32.mrf.mxu1 }
 0x20a   : > { %v4329_v46 = vpop.f32.mrf.mxu0  ;;  %v4339_v43 = vpop.f32.mrf.mxu1 }
 0x20c   : > { %v4333_v51 = vpop.f32.mrf.mxu0  ;;  %v4343_v26 = vpop.f32.mrf.mxu1 }
 0x20e   : > { %v4337_v24 = vpop.f32.mrf.mxu0  ;;  %v4347_v31 = vpop.f32.mrf.mxu1 }
 0x210   : > { %v4341_v12 = vpop.f32.mrf.mxu0  ;;  %v4351_v28 = vpop.f32.mrf.mxu1 }
 0x212   : > { %v4345_v25 = vpop.f32.mrf.mxu0  ;;  %v4355_v55 = vpop.f32.mrf.mxu1 }
 0x213   : > { %4702 = vst [vmem:[#allocation3_spill] sm:$0xff] %v4345_v25 }
 0x214   : > { %v4349_v53 = vpop.f32.mrf.mxu0  ;;  %v4359_v44 = vpop.f32.mrf.mxu1 }
 0x215   : > { %4703 = vst [vmem:[#allocation4_spill] sm:$0xff] %v4349_v53 }
 0x216   : > { %v4353_v54 = vpop.f32.mrf.mxu0  ;;  %v4363_v34 = vpop.f32.mrf.mxu1 }
 0x217   : > { %4704 = vst [vmem:[#allocation5_spill] sm:$0xff] %v4353_v54 }
 0x218   : > { %v4357_v37 = vpop.f32.mrf.mxu0 }
 0x219   : > { %4705 = vst [vmem:[#allocation6_spill] sm:$0xff] %v4357_v37 }
 0x21a   : > { %v4361_v58 = vpop.f32.mrf.mxu0 }
 0x21b   : > { %4706 = vst [vmem:[#allocation7_spill] sm:$0xff] %v4361_v58 }
 0x21c   : > { %v4365_v50 = vpop.f32.mrf.mxu0 }
 0x21e   : > { %v4367_v61 = vpop.f32.mrf.mxu0 }
 0x21f   : > { %4707 = vst [vmem:[#allocation8_spill] sm:$0xff] %v4367_v61 }
 0x220   : > { %v4371_v63 = vpop.f32.mrf.mxu0 }
 0x221   : > { %4708 = vst [vmem:[#allocation9_spill] sm:$0xff] %v4371_v63 }
 0x28d   : > { %v1952_v59 = vpop.f32.mrf.mxu1 }
 0x28f   : > { %v1954_v45 = vpop.f32.mrf.mxu1 }
 0x290   : > { %v1955_v0 = vadd.f32 %v1954_v45, %v4299_v13 }
 0x291   : > { %v1958_v15 = vpop.f32.mrf.mxu1 }
 0x292   : > { %v1959_v7 = vadd.f32 %v1958_v15, %v4301_v56 }
 0x293   : > { %v1960_v62 = vpop.f32.mrf.mxu1 }
 0x294   : > { %v1961_v41 = vadd.f32 %v1960_v62, %v1503_v10 }
 0x295   : > { %v1964_v6 = vpop.f32.mrf.mxu1 }
 0x296   : > { %v1965_v60 = vadd.f32 %v1964_v6, %v1507_v21  ;;  %v2366_v10 = vadd.f32 %v4373_v23, %v1961_v41 }
 0x297   : > { %v1966_v14 = vpop.f32.mrf.mxu1 }
 0x298   : > { %v2041_v18 = vpop.f32.mrf.mxu0  ;;  %v1967_v2 = vadd.f32 %v1966_v14, %v1509_v22  ;;  %v1953_v22 = vadd.f32 %v1952_v59, %v4297_v19  ;;  %v4382_v14 = vpop.permute.xlu1 %2337  ;;  %v2406_v59 = vmul.f32 0.1, %v2366_v10 }
 0x299   : > { %v2356_v45 = vadd.f32 %v4382_v14, %v1955_v0 }
 0x29a   : > { %v1970_v20 = vpop.f32.mrf.mxu1  ;;  %v2043_v39 = vpop.f32.mrf.mxu0  ;;  %v2376_v4 = vadd.f32 %v4375_v16, %v1967_v2  ;;  %v2355_v41 = vadd.f32 %v4382_v14, %v1953_v22 }
 0x29b   : > { %v1971_v27 = vadd.f32 %v1970_v20, %v1513_v8  ;;  %v2375_v8 = vadd.f32 %v4375_v16, %v1965_v60  ;;  %v2396_v37 = vmul.f32 0.1, %v2356_v45 }
 0x29c   : > { %v1972_v57 = vpop.f32.mrf.mxu1  ;;  %v2047_v1 = vpop.f32.mrf.mxu0  ;;  %v2416_v6 = vmul.f32 0.1, %v2376_v4 }
 0x29d   : > { %v2385_v9 = vadd.f32 %v4369_v52, %v1971_v27  ;;  %v1973_v35 = vadd.f32 %v1972_v57, %v1515_v49  ;;  %v2365_v49 = vadd.f32 %v4373_v23, %v1959_v7  ;;  %v2415_v20 = vmul.f32 0.1, %v2375_v8 }
 0x29e   : > { %v2049_v3 = vpop.f32.mrf.mxu0  ;;  %v2042_v27 = vadd.f32 %v2041_v18, %v4303_v29  ;;  %v2044_v7 = vadd.f32 %v2043_v39, %v4305_v48  ;;  %v2456_v58 = vmax.f32 %v2376_v4, %v2416_v6  ;;  %v2048_v29 = vadd.f32 %v2047_v1, %v4307_v30 }
 0x29f   : > { %v2386_v21 = vadd.f32 %v4369_v52, %v1973_v35  ;;  %v2425_v15 = vmul.f32 0.1, %v2385_v9  ;;  %v2405_v25 = vmul.f32 0.1, %v2365_v49  ;;  %v2050_v61 = vadd.f32 %v2049_v3, %v4311_v38 }
 0x2a0   : > { %v2053_v62 = vpop.f32.mrf.mxu0  ;;  %v4387_v56 = vpop.f32.mrf.mxu1  ;;  %v2455_v18 = vmax.f32 %v2375_v8, %v2415_v20  ;;  %v4400_v48 = vadd.f32 %v4382_v14, %v2042_v27  ;;  %v4406_v4 = vadd.f32 %v4382_v14, %v2044_v7  ;;  %v2436_v8 = vmax.f32 %v2356_v45, %v2396_v37 }
 0x2a1   : > { %v2426_v13 = vmul.f32 0.1, %v2386_v21  ;;  %v2465_v53 = vmax.f32 %v2385_v9, %v2425_v15  ;;  %v2054_v63 = vadd.f32 %v2053_v62, %v4315_v33  ;;  %v2395_v9 = vmul.f32 0.1, %v2355_v41 }
 0x2a2   : > { %v2055_v2 = vpop.f32.mrf.mxu0  ;;  %v2132_v19 = vpop.f32.mrf.mxu1  ;;  %v4412_v1 = vadd.f32 %v4373_v23, %v2050_v61  ;;  %v4424_v61 = vld [vmem:[%s4694_s2 + $0x40] sm:$0xff] }
 0x2a3   : > { %v2056_v60 = vadd.f32 %v2055_v2, %v4321_v40  ;;  %v2466_v35 = vmax.f32 %v2386_v21, %v2426_v13  ;;  %v2446_v21 = vmax.f32 %v2366_v10, %v2406_v59  ;;  %v2377_v30 = vadd.f32 %v4375_v16, %v2054_v63 }
 0x2a4   : > { %v2136_v57 = vpop.f32.mrf.mxu1  ;;  %v2435_v63 = vmax.f32 %v2355_v41, %v2395_v9  ;;  %v2398_v13 = vmul.f32 0.1, %v4406_v4  ;;  %v2408_v20 = vmul.f32 0.1, %v4412_v1 }
 0x2a5   : > { %v2059_v0 = vpop.f32.mrf.mxu0  ;;  %2532 = vmatprep.subr.mxu0 %v2466_v35  ;;  %v2378_v33 = vadd.f32 %v4375_v16, %v2056_v60  ;;  %v2417_v45 = vmul.f32 0.1, %v2377_v30 }
 0x2a6   : > { %v2060_v54 = vadd.f32 %v2059_v0, %v4327_v5  ;;  %v2138_v22 = vpop.f32.mrf.mxu1  ;;  %2533 = vmatpush1.msra.mxu0 %v2465_v53  ;;  %v2445_v5 = vmax.f32 %v2365_v49, %v2405_v25  ;;  %v4427_v49 = vmul.f32 0.1, %v4400_v48 }
 0x2a7   : > { %v2061_v40 = vpop.f32.mrf.mxu0  ;;  %2534 = vmatprep.subr.mxu0 %v2456_v58  ;;  %v2418_v15 = vmul.f32 0.1, %v2378_v33  ;;  %v2139_v41 = vadd.f32 %v2138_v22, %v4325_v11  ;;  %v4446_v11 = vld [vmem:[%s4694_s2 + $0x48] sm:$0xff] }
 0x2a8   : > { %v2387_v39 = vadd.f32 %v4369_v52, %v2060_v54  ;;  %v2062_v3 = vadd.f32 %v2061_v40, %v4331_v47  ;;  %v2142_v38 = vpop.f32.mrf.mxu1  ;;  %2535 = vmatpush1.msra.mxu0 %v2455_v18  ;;  %v4416_v47 = vadd.f32 %v4373_v23, %v2048_v29  ;;  %v4709_v29 = vmov 0.0  }
 0x2a9   : > { %v4409_v53 = vpop.f32.mrf.mxu0  ;;  %2536 = vmatprep.subr.mxu0 %v2446_v21  ;;  %v2143_v6 = vadd.f32 %v2142_v38, %v4329_v46 }
 0x2aa   : > { %v2388_v10 = vadd.f32 %v4369_v52, %v2062_v3  ;;  %v2144_v54 = vpop.f32.mrf.mxu1  ;;  %v2427_v25 = vmul.f32 0.1, %v2387_v39  ;;  %2537 = vmatpush1.msra.mxu0 %v2445_v5  ;;  %v2407_v35 = vmul.f32 0.1, %v4416_v47 }
 0x2ab   : > { %v2145_v58 = vadd.f32 %v2144_v54, %v4333_v51  ;;  %v4419_v62 = vpop.f32.mrf.mxu0  ;;  %2538 = vmatprep.subr.mxu0 %v2436_v8  ;;  %v2133_v51 = vadd.f32 %v2132_v19, %v4313_v32  ;;  %v2137_v32 = vadd.f32 %v2136_v57, %v4319_v36  ;;  %v2458_v36 = vmax.f32 %v2378_v33, %v2418_v15 }
 0x2ac   : > { %v2428_v37 = vmul.f32 0.1, %v2388_v10  ;;  %2539 = vmatpush1.msra.mxu0 %v2435_v63  ;;  %v2467_v7 = vmax.f32 %v2387_v39, %v2427_v25  ;;  %v2457_v57 = vmax.f32 %v2377_v30, %v2417_v45  ;;  %v4456_v21 = vadd.f32 %v4375_v16, %v2143_v6 }
 0x2ad   : > { %v2148_v2 = vpop.f32.mrf.mxu1  ;;  %v2225_v59 = vpop.f32.mrf.mxu0  ;;  %3646 = vmatmul.mubr.msk.f32.vlgmr.msra.gmra.mxu0 %vm862_vm2, %v4424_v61  ;;  %v4440_v46 = vadd.f32 %v4375_v16, %v2145_v58  ;;  %v4453_v18 = vadd.f32 %v4382_v14, %v2133_v51  ;;  %v4459_v39 = vadd.f32 %v4373_v23, %v2139_v41  ;;  %v2447_v33 = vmax.f32 %v4416_v47, %v2407_v35 }
 0x2ae   : > { %v2149_v27 = vadd.f32 %v2148_v2, %v4337_v24  ;;  %v2468_v60 = vmax.f32 %v2388_v10, %v2428_v37  ;;  %2578 = vmatprep.mubr.f32.mxu0 %v4709_v29  ;;  %v2131_v24 = vadd.f32 %v4387_v56, %v4309_v42  ;;  %v4469_v3 = vadd.f32 %v4373_v23, %v2137_v32  ;;  %v4476_v10 = vld [vmem:[%s4694_s2 + $0x50] sm:$0xff] }
 0x2af   : > { %v2150_v19 = vpop.f32.mrf.mxu1  ;;  %v2227_v0 = vpop.f32.mrf.mxu0  ;;  %v2420_v38 = vmul.f32 0.1, %v4440_v46  ;;  %v2438_v25 = vmax.f32 %v4406_v4, %v2398_v13  ;;  %v2400_v58 = vmul.f32 0.1, %v4453_v18  ;;  %v2419_v63 = vmul.f32 0.1, %v4456_v21 }
 0x2b0   : > { %v2389_v22 = vadd.f32 %v4369_v52, %v2149_v27  ;;  %v2151_v40 = vadd.f32 %v2150_v19, %v4341_v12  ;;  %2621 = vmatprep.subr.mxu1 %v2468_v60  ;;  %v2448_v12 = vmax.f32 %v4412_v1, %v2408_v20  ;;  %v2437_v1 = vmax.f32 %v4400_v48, %v4427_v49 }
 0x2b1   : > { %v2231_v9 = vpop.f32.mrf.mxu0  ;;  %2622 = vmatpush1.msra.mxu1 %v2467_v7  ;;  %3647 = vmatmul.mubr.msk.f32.gmra.mxu0 %vm862_vm2, %v4446_v11  ;;  %v4481_v54 = vadd.f32 %v4382_v14, %v2131_v24  ;;  %v2226_v15 = vadd.f32 %v2225_v59, %v4343_v26  ;;  %v2410_v48 = vmul.f32 0.1, %v4459_v39  ;;  %v2409_v13 = vmul.f32 0.1, %v4469_v3 }
 0x2b2   : > { %v2390_v42 = vadd.f32 %v4369_v52, %v2151_v40  ;;  %v4462_v56 = vpop.f32.mrf.mxu1  ;;  %2623 = vmatprep.subr.mxu1 %v2458_v36  ;;  %v2429_v5 = vmul.f32 0.1, %v2389_v22  ;;  %2584 = vmatprep.mubr.f32.mxu0 %v4709_v29  ;;  %v2232_v49 = vadd.f32 %v2231_v9, %v4351_v28  ;;  %v2228_v26 = vadd.f32 %v2227_v0, %v4347_v31  ;;  %v4501_v28 = vld [vmem:[%s4694_s2 + $0x58] sm:$0xff] }
 0x2b3   : > { %v2233_v30 = vpop.f32.mrf.mxu0  ;;  %2624 = vmatpush1.msra.mxu1 %v2457_v57  ;;  %v2399_v31 = vmul.f32 0.1, %v4481_v54  ;;  %v2459_v60 = vmax.f32 %v4456_v21, %v2419_v63  ;;  %v2220_v35 = vadd.f32 %v4409_v53, %v4335_v17  ;;  %v2222_v7 = vadd.f32 %v4419_v62, %v4339_v43 }
 0x2b4   : > { %v2430_v8 = vmul.f32 0.1, %v2390_v42  ;;  %v4483_v47 = vpop.f32.mrf.mxu1  ;;  %2625 = vmatprep.subr.mxu1 %v2448_v12  ;;  %v2234_v37 = vadd.f32 %v2233_v30, %v4355_v55  ;;  %v2469_v2 = vmax.f32 %v2389_v22, %v2429_v5  ;;  %v2450_v19 = vmax.f32 %v4459_v39, %v2410_v48  ;;  %v4710_v39 = vld [vmem:[#allocation7_spill] sm:$0xff]  ;;  %v4712_v30 = vld [vmem:[#allocation8_spill] sm:$0xff]  ;;  %v4714_v48 = vld [vmem:[#allocation9_spill] sm:$0xff] }
 0x2b5   : > { %v2237_v45 = vpop.f32.mrf.mxu0  ;;  %2626 = vmatpush1.msra.mxu1 %v2447_v33  ;;  %3648 = vmatmul.mubr.msk.f32.gmra.mxu0 %vm862_vm2, %v4476_v10  ;;  %v2449_v0 = vmax.f32 %v4469_v3, %v2409_v13  ;;  %v2372_v17 = vadd.f32 %v4373_v23, %v2228_v26  ;;  %v2440_v43 = vmax.f32 %v4453_v18, %v2400_v58  ;;  %v4716_v26 = vld [vmem:[#allocation3_spill] sm:$0xff] }
 0x2b6   : > { %v2238_v51 = vadd.f32 %v2237_v45, %v4359_v44  ;;  %v2314_v6 = vpop.f32.mrf.mxu1  ;;  %2627 = vmatprep.subr.mxu1 %v2438_v25  ;;  %v2470_v4 = vmax.f32 %v2390_v42, %v2430_v8  ;;  %2590 = vmatprep.mubr.f32.mxu0 %v4709_v29  ;;  %v2460_v44 = vmax.f32 %v4440_v46, %v2420_v38  ;;  %v4711_v38 = vld [vmem:[#allocation5_spill] sm:$0xff] }
 0x2b7   : > { %v2239_v55 = vpop.f32.mrf.mxu0  ;;  %2628 = vmatpush1.msra.mxu1 %v2437_v1  ;;  %v4505_v59 = vadd.f32 %v4375_v16, %v2234_v37  ;;  %v2371_v53 = vadd.f32 %v4373_v23, %v2226_v15  ;;  %v2439_v36 = vmax.f32 %v4481_v54, %v2399_v31  ;;  %v2362_v57 = vadd.f32 %v4382_v14, %v2222_v7 }
 0x2b8   : > { %v2391_v20 = vadd.f32 %v4369_v52, %v2238_v51  ;;  %v2240_v41 = vadd.f32 %v2239_v55, %v4363_v34  ;;  %v2316_v27 = vpop.f32.mrf.mxu1  ;;  %3650 = vmatmul.mubr.msk.f32.vlgmr.msra.gmra.mxu1 %vm862_vm2, %v4424_v61  ;;  %2710 = vmatprep.subr.mxu0 %v2470_v4  ;;  %v2381_v34 = vadd.f32 %v4375_v16, %v2232_v49  ;;  %v2412_v3 = vmul.f32 0.1, %v2372_v17  ;;  %v4715_v4 = vld [vmem:[#allocation4_spill] sm:$0xff] }
 0x2b9   : > { %2711 = vmatpush1.msra.mxu0 %v2469_v2  ;;  %2667 = vmatprep.mubr.f32.mxu1 %v4709_v29  ;;  %v2422_v62 = vmul.f32 0.1, %v4505_v59  ;;  %v2361_v18 = vadd.f32 %v4382_v14, %v2220_v35  ;;  %v2315_v5 = vadd.f32 %v2314_v6, %v4711_v38  ;;  %v2411_v54 = vmul.f32 0.1, %v2371_v53 }
 0x2ba   : > { %v2392_v32 = vadd.f32 %v4369_v52, %v2240_v41  ;;  %v2320_v46 = vpop.f32.mrf.mxu1  ;;  %3649 = vmatmul.mubr.msk.f32.gmra.mxu0 %vm862_vm2, %v4501_v28  ;;  %2712 = vmatprep.subr.mxu0 %v2460_v44  ;;  %v2431_v24 = vmul.f32 0.1, %v2391_v20  ;;  %v2421_v9 = vmul.f32 0.1, %v2381_v34  ;;  %v2402_v15 = vmul.f32 0.1, %v2362_v57 }
 0x2bb   : > { %2713 = vmatpush1.msra.mxu0 %v2459_v60  ;;  %2750 = vmatprep.mubr.f32.mxu0 %v4709_v29  ;;  %v2321_v42 = vadd.f32 %v2320_v46, %v4710_v39  ;;  %v2462_v63 = vmax.f32 %v4505_v59, %v2422_v62  ;;  %v2401_v51 = vmul.f32 0.1, %v2361_v18  ;;  %v2311_v13 = vadd.f32 %v4483_v47, %v4715_v4 }
 0x2bc   : > { %v2432_v22 = vmul.f32 0.1, %v2392_v32  ;;  %v2322_v40 = vpop.f32.mrf.mxu1  ;;  %3651 = vmatmul.mubr.msk.f32.gmra.mxu1 %vm862_vm2, %v4446_v11  ;;  %2714 = vmatprep.subr.mxu0 %v2450_v19  ;;  %v2471_v8 = vmax.f32 %v2391_v20, %v2431_v24  ;;  %v2461_v6 = vmax.f32 %v2381_v34, %v2421_v9  ;;  %v2309_v55 = vadd.f32 %v4462_v56, %v4716_v26 }
 0x2bd   : > { %v2323_v21 = vadd.f32 %v2322_v40, %v4365_v50  ;;  %2715 = vmatpush1.msra.mxu0 %v2449_v0  ;;  %2673 = vmatprep.mubr.f32.mxu1 %v4709_v29  ;;  %v4713_v50 = vld [vmem:[#allocation6_spill] sm:$0xff]  ;;  %v2383_v2 = vadd.f32 %v4375_v16, %v2321_v42  ;;  %v2452_v59 = vmax.f32 %v2372_v17, %v2412_v3 }
 0x2be   : > { %v2326_v12 = vpop.f32.mrf.mxu1  ;;  %2716 = vmatprep.subr.mxu0 %v2440_v43  ;;  %v2472_v33 = vmax.f32 %v2392_v32, %v2432_v22  ;;  %v2317_v25 = vadd.f32 %v2316_v27, %v4713_v50  ;;  %v2451_v20 = vmax.f32 %v2371_v53, %v2411_v54  ;;  %v2442_v56 = vmax.f32 %v2362_v57, %v2402_v15 }
 0x2bf   : > { %v2327_v1 = vadd.f32 %v2326_v12, %v4712_v30  ;;  %2717 = vmatpush1.msra.mxu0 %v2439_v36  ;;  %v2384_v37 = vadd.f32 %v4375_v16, %v2323_v21  ;;  %v2373_v16 = vadd.f32 %v4373_v23, %v2315_v5  ;;  %v2364_v60 = vadd.f32 %v4382_v14, %v2311_v13 }
 0x2c0   : > { %v2328_v58 = vpop.f32.mrf.mxu1  ;;  %3652 = vmatmul.mubr.msk.f32.gmra.mxu1 %vm862_vm2, %v4476_v10  ;;  %3654 = vmatmul.mubr.msk.f32.vlgmr.msra.gmra.mxu0 %vm862_vm2, %v4424_v61  ;;  %v2374_v41 = vadd.f32 %v4373_v23, %v2317_v25  ;;  %v2423_v35 = vmul.f32 0.1, %v2383_v2  ;;  %v2363_v7 = vadd.f32 %v4382_v14, %v2309_v55  ;;  %v3720_v22 = vmov 4  }
 0x2c1   : > { %v2393_v45 = vadd.f32 %v4369_v52, %v2327_v1  ;;  %v2329_v49 = vadd.f32 %v2328_v58, %v4714_v48  ;;  %2799 = vmatprep.subr.mxu1 %v2472_v33  ;;  %2679 = vmatprep.mubr.f32.mxu1 %v4709_v29  ;;  %v2424_v47 = vmul.f32 0.1, %v2384_v37  ;;  %v2413_v46 = vmul.f32 0.1, %v2373_v16 }
 0x2c2   : > { %2800 = vmatpush1.msra.mxu1 %v2471_v8  ;;  %2756 = vmatprep.mubr.f32.mxu0 %v4709_v29  ;;  %v2414_v34 = vmul.f32 0.1, %v2374_v41  ;;  %v2404_v0 = vmul.f32 0.1, %v2364_v60  ;;  %v2463_v17 = vmax.f32 %v2383_v2, %v2423_v35  ;;  %v2403_v14 = vmul.f32 0.1, %v2363_v7 }
 0x2c3   : > { %v2394_v44 = vadd.f32 %v4369_v52, %v2329_v49  ;;  %2801 = vmatprep.subr.mxu1 %v2462_v63  ;;  %v2433_v27 = vmul.f32 0.1, %v2393_v45  ;;  %v2441_v52 = vmax.f32 %v2361_v18, %v2401_v51  ;;  %v2464_v19 = vmax.f32 %v2384_v37, %v2424_v47  ;;  %3701 = vset.pattern.permute.xlu1 %v3720_v22  ;;  %v4601_v18 = vpop.permute.xlu0 %2493 }
 0x2c4   : > { %2802 = vmatpush1.msra.mxu1 %v2461_v6  ;;  %3655 = vmatmul.mubr.msk.f32.gmra.mxu0 %vm862_vm2, %v4446_v11  ;;  %v2454_v43 = vmax.f32 %v2374_v41, %v2414_v34  ;;  %v2453_v53 = vmax.f32 %v2373_v16, %v2413_v46  ;;  %v2444_v62 = vmax.f32 %v2364_v60, %v2404_v0 }
 0x2c5   : > { %v2434_v31 = vmul.f32 0.1, %v2394_v44  ;;  %3653 = vmatmul.mubr.msk.f32.gmra.mxu1 %vm862_vm2, %v4501_v28  ;;  %2803 = vmatprep.subr.mxu1 %v2452_v59  ;;  %v2473_v32 = vmax.f32 %v2393_v45, %v2433_v27  ;;  %v2443_v24 = vmax.f32 %v2363_v7, %v2403_v14 }
 0x2c6   : > { %2804 = vmatpush1.msra.mxu1 %v2451_v20  ;;  %2762 = vmatprep.mubr.f32.mxu0 %v4709_v29 }
 0x2c7   : > { %2805 = vmatprep.subr.mxu1 %v2442_v56  ;;  %2839 = vmatprep.mubr.f32.mxu1 %v4709_v29  ;;  %v2474_v23 = vmax.f32 %v2394_v44, %v2434_v31  ;;  %v4608_v1 = vpop.permute.xlu0 %2481 }
 0x2c8   : > { %2806 = vmatpush1.msra.mxu1 %v2441_v52  ;;  %3656 = vmatmul.mubr.msk.f32.gmra.mxu0 %vm862_vm2, %v4476_v10 }
 0x2c9   : > { %3658 = vmatmul.mubr.msk.f32.vlgmr.msra.gmra.mxu1 %vm862_vm2, %v4424_v61  ;;  %2888 = vmatprep.subr.mxu0 %v2474_v23 }
 0x2ca   : > { %2889 = vmatpush1.msra.mxu0 %v2473_v32  ;;  %2768 = vmatprep.mubr.f32.mxu0 %v4709_v29 }
 0x2cb   : > { %2890 = vmatprep.subr.mxu0 %v2464_v19  ;;  %2845 = vmatprep.mubr.f32.mxu1 %v4709_v29 }
 0x2cc   : > { %2891 = vmatpush1.msra.mxu0 %v2463_v17  ;;  %3702 = vset.pattern.permute.xlu0 %v3720_v22 }
 0x2cd   : > { %3657 = vmatmul.mubr.msk.f32.gmra.mxu0 %vm862_vm2, %v4501_v28  ;;  %3659 = vmatmul.mubr.msk.f32.gmra.mxu1 %vm862_vm2, %v4446_v11 }
 0x2ce   : > { %2892 = vmatprep.subr.mxu0 %v2454_v43  ;;  %2851 = vmatprep.mubr.f32.mxu1 %v4709_v29  ;;  %v4630_v43 = vld [vmem:[%s4694_s2 + $0x60] sm:$0xff] }
 0x2cf   : > { %2893 = vmatpush1.msra.mxu0 %v2453_v53  ;;  %2928 = vmatprep.mubr.f32.mxu0 %v4709_v29 }
 0x2d0   : > { %2894 = vmatprep.subr.mxu0 %v2444_v62 }
 0x2d1   : > { %2895 = vmatpush1.msra.mxu0 %v2443_v24  ;;  %3660 = vmatmul.mubr.msk.f32.gmra.mxu1 %vm862_vm2, %v4476_v10 }
 0x2d2   : > { %3662 = vmatmul.mubr.msk.f32.vlgmr.msra.gmra.mxu0 %vm862_vm2, %v4424_v61  ;;  %2857 = vmatprep.mubr.f32.mxu1 %v4709_v29  ;;  %v3035_v61 = vld [vmem:[%s4695_s3] sm:$0x1] }
 0x2d3   : > { %2934 = vmatprep.mubr.f32.mxu0 %v4709_v29  ;;  %3038 = vperm.xlu1 %3701, %v3035_v61  }
 0x2d5   : > { %3661 = vmatmul.mubr.msk.f32.gmra.mxu1 %vm862_vm2, %v4501_v28 }
 0x2d6   : > { %3663 = vmatmul.mubr.msk.f32.gmra.mxu0 %vm862_vm2, %v4446_v11  ;;  %3108 = vmatprep.mubr.f32.mxu1 %v4709_v29 }
 0x2d7   : > { %2940 = vmatprep.mubr.f32.mxu0 %v4709_v29 }
 0x2da   : > { %3664 = vmatmul.mubr.msk.f32.gmra.mxu0 %vm862_vm2, %v4476_v10  ;;  %v4599_v10 = vpop.permute.xlu1 %2489 }
 0x2db   : > { %2946 = vmatprep.mubr.f32.mxu0 %v4709_v29 }
 0x2de   : > { %3665 = vmatmul.mubr.msk.f32.gmra.mxu0 %vm862_vm2, %v4501_v28  ;;  %v4604_v33 = vpop.permute.xlu1 %2485 }
 0x2df   : > { %3250 = vmatprep.mubr.f32.mxu0 %v4709_v29 }
 0x36d   : > { %v2574_v11 = vpop.f32.mrf.mxu0 }
 0x36e   : > { %v2575_v51 = vadd.f32 %v2574_v11, %v4608_v1 }
 0x36f   : > { %v2576_v40 = vpop.f32.mrf.mxu0 }
 0x370   : > { %v2577_v48 = vadd.f32 %v2576_v40, %v4608_v1  ;;  %v2953_v16 = vmul.f32 0.1, %v2575_v51 }
 0x371   : > { %v2580_v36 = vpop.f32.mrf.mxu0 }
 0x372   : > { %v2581_v58 = vadd.f32 %v2580_v36, %v4604_v33  ;;  %v2954_v20 = vmul.f32 0.1, %v2577_v48  ;;  %v2993_v14 = vmax.f32 %v2575_v51, %v2953_v16 }
 0x373   : > { %v2582_v57 = vpop.f32.mrf.mxu0 }
 0x374   : > { %v2583_v50 = vadd.f32 %v2582_v57, %v4604_v33  ;;  %v2963_v55 = vmul.f32 0.1, %v2581_v58  ;;  %v2994_v19 = vmax.f32 %v2577_v48, %v2954_v20 }
 0x375   : > { %v2586_v21 = vpop.f32.mrf.mxu0 }
 0x376   : > { %v2587_v30 = vadd.f32 %v2586_v21, %v4599_v10  ;;  %v2964_v2 = vmul.f32 0.1, %v2583_v50  ;;  %v3003_v7 = vmax.f32 %v2581_v58, %v2963_v55 }
 0x377   : > { %v2588_v28 = vpop.f32.mrf.mxu0 }
 0x378   : > { %v2663_v9 = vpop.f32.mrf.mxu1  ;;  %v2589_v3 = vadd.f32 %v2588_v28, %v4599_v10  ;;  %v2973_v49 = vmul.f32 0.1, %v2587_v30  ;;  %v3004_v52 = vmax.f32 %v2583_v50, %v2964_v2 }
 0x379   : > { %v2664_v22 = vadd.f32 %v2663_v9, %v4608_v1 }
 0x37a   : > { %v2592_v39 = vpop.f32.mrf.mxu0  ;;  %v2665_v42 = vpop.f32.mrf.mxu1  ;;  %v2974_v63 = vmul.f32 0.1, %v2589_v3  ;;  %v3013_v27 = vmax.f32 %v2587_v30, %v2973_v49 }
 0x37b   : > { %v2593_v12 = vadd.f32 %v2592_v39, %v4601_v18  ;;  %v2666_v53 = vadd.f32 %v2665_v42, %v4608_v1 }
 0x37c   : > { %v2594_v38 = vpop.f32.mrf.mxu0  ;;  %v2669_v5 = vpop.f32.mrf.mxu1  ;;  %v3014_v44 = vmax.f32 %v2589_v3, %v2974_v63 }
 0x37d   : > { %v2595_v54 = vadd.f32 %v2594_v38, %v4601_v18  ;;  %v2983_v25 = vmul.f32 0.1, %v2593_v12  ;;  %v2670_v0 = vadd.f32 %v2669_v5, %v4604_v33  ;;  %v2956_v42 = vmul.f32 0.1, %v2666_v53 }
 0x37e   : > { %v2671_v8 = vpop.f32.mrf.mxu1  ;;  %v2955_v5 = vmul.f32 0.1, %v2664_v22 }
 0x37f   : > { %v2984_v15 = vmul.f32 0.1, %v2595_v54  ;;  %v3023_v26 = vmax.f32 %v2593_v12, %v2983_v25  ;;  %v2672_v23 = vadd.f32 %v2671_v8, %v4604_v33  ;;  %v2965_v28 = vmul.f32 0.1, %v2670_v0 }
 0x380   : > { %v2675_v37 = vpop.f32.mrf.mxu1  ;;  %v4613_v45 = vpop.f32.mrf.mxu0  ;;  %v2996_v51 = vmax.f32 %v2666_v53, %v2956_v42  ;;  %v2995_v55 = vmax.f32 %v2664_v22, %v2955_v5 }
 0x381   : > { %v3024_v6 = vmax.f32 %v2595_v54, %v2984_v15  ;;  %v2676_v60 = vadd.f32 %v2675_v37, %v4599_v10  ;;  %v2966_v57 = vmul.f32 0.1, %v2672_v23  ;;  %v3005_v15 = vmax.f32 %v2670_v0, %v2965_v28 }
 0x382   : > { %v2677_v4 = vpop.f32.mrf.mxu1  ;;  %v4617_v13 = vpop.f32.mrf.mxu0 }
 0x383   : > { %3068 = vmatprep.subr.mxu1 %v3024_v6  ;;  %v2678_v47 = vadd.f32 %v2677_v4, %v4599_v10  ;;  %v2975_v11 = vmul.f32 0.1, %v2676_v60  ;;  %v3006_v25 = vmax.f32 %v2672_v23, %v2966_v57  ;;  %v2755_v6 = vadd.f32 %v4617_v13, %v4608_v1 }
 0x384   : > { %v2758_v59 = vpop.f32.mrf.mxu0  ;;  %3069 = vmatpush1.msra.mxu1 %v3023_v26 }
 0x385   : > { %v2681_v41 = vpop.f32.mrf.mxu1  ;;  %3070 = vmatprep.subr.mxu1 %v3014_v44  ;;  %v2976_v62 = vmul.f32 0.1, %v2678_v47  ;;  %v3015_v30 = vmax.f32 %v2676_v60, %v2975_v11  ;;  %v2759_v37 = vadd.f32 %v2758_v59, %v4604_v33  ;;  %v2753_v44 = vadd.f32 %v4613_v45, %v4608_v1 }
 0x386   : > { %v2682_v31 = vadd.f32 %v2681_v41, %v4601_v18  ;;  %v2760_v56 = vpop.f32.mrf.mxu0  ;;  %3071 = vmatpush1.msra.mxu1 %v3013_v27 }
 0x387   : > { %v2683_v35 = vpop.f32.mrf.mxu1  ;;  %3072 = vmatprep.subr.mxu1 %v3004_v52  ;;  %v3016_v3 = vmax.f32 %v2678_v47, %v2976_v62  ;;  %v2761_v58 = vadd.f32 %v2760_v56, %v4604_v33  ;;  %v2967_v47 = vmul.f32 0.1, %v2759_v37  ;;  %v2958_v56 = vmul.f32 0.1, %v2755_v6 }
 0x388   : > { %v2985_v34 = vmul.f32 0.1, %v2682_v31  ;;  %v2684_v32 = vadd.f32 %v2683_v35, %v4601_v18  ;;  %v2764_v46 = vpop.f32.mrf.mxu0  ;;  %3073 = vmatpush1.msra.mxu1 %v3003_v7  ;;  %v2957_v45 = vmul.f32 0.1, %v2753_v44 }
 0x389   : > { %v4625_v17 = vpop.f32.mrf.mxu1  ;;  %3074 = vmatprep.subr.mxu1 %v2994_v19  ;;  %v2765_v54 = vadd.f32 %v2764_v46, %v4599_v10  ;;  %v2968_v59 = vmul.f32 0.1, %v2761_v58  ;;  %v3007_v53 = vmax.f32 %v2759_v37, %v2967_v47 }
 0x38a   : > { %v2986_v24 = vmul.f32 0.1, %v2684_v32  ;;  %v2766_v61 = vpop.f32.mrf.mxu0  ;;  %v3025_v40 = vmax.f32 %v2682_v31, %v2985_v34  ;;  %3075 = vmatpush1.msra.mxu1 %v2993_v14  ;;  %v2842_v28 = vadd.f32 %v4625_v17, %v4608_v1 }
 0x38b   : > { %v4634_v36 = vpop.f32.mrf.mxu1  ;;  %3667 = vmatmul.mubr.msk.f32.vlgmr.msra.gmra.mxu1 %vm862_vm2, %v4630_v43  ;;  %v2767_v38 = vadd.f32 %v2766_v61, %v4599_v10  ;;  %v2977_v20 = vmul.f32 0.1, %v2765_v54  ;;  %v3008_v46 = vmax.f32 %v2761_v58, %v2968_v59  ;;  %v2998_v61 = vmax.f32 %v2755_v6, %v2958_v56 }
 0x38c   : > { %v3026_v21 = vmax.f32 %v2684_v32, %v2986_v24  ;;  %3179 = vmatprep.mubr.f32.mxu1 %v4709_v29  ;;  %v2844_v22 = vadd.f32 %v4634_v36, %v4608_v1 }
 0x38d   : > { %v2770_v39 = vpop.f32.mrf.mxu0  ;;  %v2847_v12 = vpop.f32.mrf.mxu1  ;;  %v2978_v4 = vmul.f32 0.1, %v2767_v38  ;;  %v3017_v23 = vmax.f32 %v2765_v54, %v2977_v20  ;;  %v2959_v54 = vmul.f32 0.1, %v2842_v28 }
 0x38e   : > { %v2771_v9 = vadd.f32 %v2770_v39, %v4601_v18  ;;  %3139 = vmatprep.subr.mxu1 %v3026_v21  ;;  %v2848_v62 = vadd.f32 %v2847_v12, %v4604_v33  ;;  %v2997_v21 = vmax.f32 %v2753_v44, %v2957_v45  ;;  %v2960_v5 = vmul.f32 0.1, %v2844_v22  ;;  %v3039_v45 = vpop.permute.xlu1 %3038 }
 0x38f   : > { %v2772_v8 = vpop.f32.mrf.mxu0  ;;  %v2849_v50 = vpop.f32.mrf.mxu1  ;;  %3140 = vmatpush1.msra.mxu1 %v3025_v40  ;;  %v3018_v52 = vmax.f32 %v2767_v38, %v2978_v4  ;;  %v2999_v4 = vmax.f32 %v2842_v28, %v2959_v54 }
 0x390   : > { %v2773_v63 = vadd.f32 %v2772_v8, %v4601_v18  ;;  %3141 = vmatprep.subr.mxu1 %v3016_v3  ;;  %v2987_v48 = vmul.f32 0.1, %v2771_v9  ;;  %v2850_v19 = vadd.f32 %v2849_v50, %v4604_v33  ;;  %v2969_v12 = vmul.f32 0.1, %v2848_v62 }
 0x391   : > { %v2853_v49 = vpop.f32.mrf.mxu1  ;;  %3142 = vmatpush1.msra.mxu1 %v3015_v30 }
 0x392   : > { %v2988_v2 = vmul.f32 0.1, %v2773_v63  ;;  %v4647_v26 = vpop.f32.mrf.mxu0  ;;  %3143 = vmatprep.subr.mxu1 %v3006_v25  ;;  %v3027_v31 = vmax.f32 %v2771_v9, %v2987_v48  ;;  %v2854_v34 = vadd.f32 %v2853_v49, %v4599_v10  ;;  %v2970_v42 = vmul.f32 0.1, %v2850_v19 }
 0x393   : > { %v2855_v41 = vpop.f32.mrf.mxu1  ;;  %3144 = vmatpush1.msra.mxu1 %v3005_v15  ;;  %v3009_v15 = vmax.f32 %v2848_v62, %v2969_v12  ;;  %v3000_v49 = vmax.f32 %v2844_v22, %v2960_v5 }
 0x394   : > { %v3028_v27 = vmax.f32 %v2773_v63, %v2988_v2  ;;  %v4651_v16 = vpop.f32.mrf.mxu0  ;;  %3145 = vmatprep.subr.mxu1 %v2996_v51  ;;  %v2856_v60 = vadd.f32 %v2855_v41, %v4599_v10  ;;  %v2979_v39 = vmul.f32 0.1, %v2854_v34  ;;  %v3010_v25 = vmax.f32 %v2850_v19, %v2970_v42 }
 0x395   : > { %v2859_v13 = vpop.f32.mrf.mxu1  ;;  %3146 = vmatpush1.msra.mxu1 %v2995_v55 }
 0x396   : > { %v2860_v35 = vadd.f32 %v2859_v13, %v4601_v18  ;;  %v2936_v7 = vpop.f32.mrf.mxu0  ;;  %3210 = vmatprep.subr.mxu0 %v3028_v27  ;;  %3668 = vmatmul.mubr.msk.f32.vlgmr.msra.gmra.mxu1 %vm862_vm2, %v4630_v43  ;;  %v2980_v11 = vmul.f32 0.1, %v2856_v60  ;;  %v3019_v8 = vmax.f32 %v2854_v34, %v2979_v39 }
 0x397   : > { %v2861_v32 = vpop.f32.mrf.mxu1  ;;  %3211 = vmatpush1.msra.mxu0 %v3027_v31  ;;  %3321 = vmatprep.mubr.f32.mxu1 %v4709_v29  ;;  %v2937_v51 = vadd.f32 %v2936_v7, %v4604_v33 }
 0x398   : > { %v2862_v0 = vadd.f32 %v2861_v32, %v4601_v18  ;;  %v2938_v14 = vpop.f32.mrf.mxu0  ;;  %3212 = vmatprep.subr.mxu0 %v3018_v52  ;;  %v2989_v24 = vmul.f32 0.1, %v2860_v35  ;;  %v3020_v30 = vmax.f32 %v2856_v60, %v2980_v11 }
 0x399   : > { %3213 = vmatpush1.msra.mxu0 %v3017_v23  ;;  %v2939_v37 = vadd.f32 %v2938_v14, %v4604_v33  ;;  %v2971_v41 = vmul.f32 0.1, %v2937_v51 }
 0x39a   : > { %v2990_v40 = vmul.f32 0.1, %v2862_v0  ;;  %v2942_v57 = vpop.f32.mrf.mxu0  ;;  %3214 = vmatprep.subr.mxu0 %v3008_v46  ;;  %v3029_v9 = vmax.f32 %v2860_v35, %v2989_v24  ;;  %v3721_v35 = vmov 1966171168  }
 0x39b   : > { %3215 = vmatpush1.msra.mxu0 %v3007_v53  ;;  %v2943_v58 = vadd.f32 %v2942_v57, %v4599_v10  ;;  %v2972_v20 = vmul.f32 0.1, %v2939_v37  ;;  %v3011_v13 = vmax.f32 %v2937_v51, %v2971_v41  ;;  %v3414_v7 = vunpack.c.l.s4 %v3721_v35 }
 0x39c   : > { %v3030_v3 = vmax.f32 %v2862_v0, %v2990_v40  ;;  %v2944_v38 = vpop.f32.mrf.mxu0  ;;  %3216 = vmatprep.subr.mxu0 %v2998_v61  ;;  %v4717_v61 = vld [vmem:[#allocation2_spill] sm:$0xff] }
 0x39d   : > { %3217 = vmatpush1.msra.mxu0 %v2997_v21  ;;  %v2945_v17 = vadd.f32 %v2944_v38, %v4599_v10  ;;  %v2931_v10 = vadd.f32 %v4647_v26, %v4608_v1  ;;  %v2981_v44 = vmul.f32 0.1, %v2943_v58  ;;  %v3012_v31 = vmax.f32 %v2939_v37, %v2972_v20 }
 0x39e   : > { %v2948_v36 = vpop.f32.mrf.mxu0  ;;  %3281 = vmatprep.subr.mxu1 %v3030_v3  ;;  %3669 = vmatmul.mubr.msk.f32.vlgmr.msra.gmra.mxu0 %vm862_vm2, %v4630_v43  ;;  %v3415_v32 = vunpack.c.0.s8 %v3414_v7  ;;  %v4718_v37 = vlaneseq }
 0x39f   : > { %v2949_v50 = vadd.f32 %v2948_v36, %v4601_v18  ;;  %3282 = vmatpush1.msra.mxu1 %v3029_v9  ;;  %3392 = vmatprep.mubr.f32.mxu0 %v4709_v29  ;;  %v2933_v29 = vadd.f32 %v4651_v16, %v4608_v1  ;;  %v2982_v2 = vmul.f32 0.1, %v2945_v17  ;;  %v2961_v16 = vmul.f32 0.1, %v2931_v10 }
 0x3a0   : > { %v2950_v63 = vpop.f32.mrf.mxu0  ;;  %3283 = vmatprep.subr.mxu1 %v3020_v30  ;;  %v3021_v47 = vmax.f32 %v2943_v58, %v2981_v44  ;;  %v3418_v22 = vsub.s32 %v3415_v32, %v4717_v61  ;;  %vm3478_vm3 = vcmp.lt.s32.totalorder %v4718_v37, 256 }
 0x3a1   : > { %v2951_v48 = vadd.f32 %v2950_v63, %v4601_v18  ;;  %3284 = vmatpush1.msra.mxu1 %v3019_v8  ;;  %v2991_v6 = vmul.f32 0.1, %v2949_v50  ;;  %v2962_v33 = vmul.f32 0.1, %v2933_v29  ;;  %v3022_v27 = vmax.f32 %v2945_v17, %v2982_v2 }
 0x3a2   : > { %3285 = vmatprep.subr.mxu1 %v3010_v25  ;;  %v3001_v26 = vmax.f32 %v2931_v10, %v2961_v16 }
 0x3a3   : > { %v2992_v55 = vmul.f32 0.1, %v2951_v48  ;;  %3286 = vmatpush1.msra.mxu1 %v3009_v15  ;;  %v3031_v59 = vmax.f32 %v2949_v50, %v2991_v6  ;;  %v3002_v1 = vmax.f32 %v2933_v29, %v2962_v33 }
 0x3a4   : > { %3287 = vmatprep.subr.mxu1 %v3000_v49 }
 0x3a5   : > { %v3032_v18 = vmax.f32 %v2951_v48, %v2992_v55  ;;  %3288 = vmatpush1.msra.mxu1 %v2999_v4 }
 0x3a6   : > { %3670 = vmatmul.mubr.msk.f32.vlgmr.msra.gmra.mxu1 %vm862_vm2, %v4630_v43 }
 0x3a7   : > { %3352 = vmatprep.subr.mxu0 %v3032_v18 }
 0x3a8   : > { %3353 = vmatpush1.msra.mxu0 %v3031_v59 }
 0x3a9   : > { %3354 = vmatprep.subr.mxu0 %v3022_v27 }
 0x3aa   : > { %3355 = vmatpush1.msra.mxu0 %v3021_v47 }
 0x3ab   : > { %3356 = vmatprep.subr.mxu0 %v3012_v31 }
 0x3ac   : > { %3357 = vmatpush1.msra.mxu0 %v3011_v13 }
 0x3ad   : > { %3358 = vmatprep.subr.mxu0 %v3002_v1 }
 0x3ae   : > { %3359 = vmatpush1.msra.mxu0 %v3001_v26 }
 0x3af   : > { %3671 = vmatmul.mubr.msk.f32.vlgmr.msra.gmra.mxu0 %vm862_vm2, %v4630_v43 }
 0x44b   : > { %v3110_v56 = vpop.f32.mrf.mxu1 }
 0x44c   : > { %v3111_v19 = vadd.f32 %v3110_v56, %v3039_v45 }
 0x44d   : > { %v3112_v52 = vpop.f32.mrf.mxu1 }
 0x44e   : > { %v3113_v0 = vadd.f32 %v3112_v52, %v3039_v45 }
 0x450   : > { %v3409_v11 = vcombine.low %v3111_v19, %v3113_v0 }
 0x452   : > { %v3419_v39 = vrot.slane %v3409_v11, %v3418_v22 }
 0x456   : > { %v3181_v60 = vpop.f32.mrf.mxu1 }
 0x457   : > { %v3182_v14 = vadd.f32 %v3181_v60, %v3039_v45 }
 0x458   : > { %v3183_v23 = vpop.f32.mrf.mxu1 }
 0x459   : > { %v3184_v53 = vadd.f32 %v3183_v23, %v3039_v45 }
 0x45b   : > { %v3410_v43 = vcombine.low %v3182_v14, %v3184_v53 }
 0x45d   : > { %v3426_v42 = vrot.slane %v3410_v43, %v3418_v22 }
 0x45e   : > { %v3252_v34 = vpop.f32.mrf.mxu0 }
 0x45f   : > { %v3253_v62 = vadd.f32 %v3252_v34, %v3039_v45  ;;  %v3441_v9 = vcombine.low %v3419_v39, %v3426_v42 }
 0x460   : > { %v3254_v46 = vpop.f32.mrf.mxu0 }
 0x461   : > { %v3255_v24 = vadd.f32 %v3254_v46, %v3039_v45  ;;  %v3449_v54 = vrot.slane %v3441_v9, %v3418_v22 }
 0x463   : > { %v3411_v21 = vcombine.low %v3253_v62, %v3255_v24 }
 0x465   : > { %v3433_v38 = vrot.slane %v3411_v21, %v3418_v22 }
 0x466   : > { %v3323_v40 = vpop.f32.mrf.mxu1 }
 0x467   : > { %v3324_v57 = vadd.f32 %v3323_v40, %v3039_v45 }
 0x468   : > { %v3325_v28 = vpop.f32.mrf.mxu1 }
 0x469   : > { %v3326_v3 = vadd.f32 %v3325_v28, %v3039_v45 }
 0x46b   : > { %v3412_v12 = vcombine.low %v3324_v57, %v3326_v3 }
 0x46d   : > { %v3440_v5 = vrot.slane %v3412_v12, %v3418_v22 }
 0x46f   : > { %v3442_v30 = vcombine.low %v3433_v38, %v3440_v5  ;;  %v3394_v36 = vpop.f32.mrf.mxu0 }
 0x470   : > { %v3395_v50 = vadd.f32 %v3394_v36, %v3039_v45 }
 0x471   : > { %v3456_v8 = vrot.slane %v3442_v30, %v3418_v22  ;;  %v3396_v17 = vpop.f32.mrf.mxu0 }
 0x472   : > { %v3397_v25 = vadd.f32 %v3396_v17, %v3039_v45 }
 0x473   : > { %v3457_v58 = vcombine.low %v3449_v54, %v3456_v8 }
 0x474   : > { %v3458_v63 = vcombine.low %v3395_v50, %v3397_v25 }
 0x475   : > { %3475 = vst [vmem:[%s197_s29] sm:$0xff] %v3457_v58 }
 0x476   : > { %v3465_v15 = vrot.slane %v3458_v63, %v3418_v22 }
 0x478   : > { %v3472_v48 = vrot.slane %v3465_v15, %v3418_v22 }
 0x47a   : > { %3480 = vst.msk [vmem:[%s197_s29 + $0x8] sm:$0x3] %vm3478_vm3, %v3472_v48 }
 0x47b PF: > { %s14_s15 = sadd.s32 1, %s3711_s15  }
 0x47c   : > { %p11_p4 = scmp.ge.s32.totalorder %s14_s15, 4  }
 0x47e   :  { %13 = sbr.rel (!%p11_p4) target bundleno = 1 (0x1), region = 69 }

</bundles_post_ra>
